<compile_context>
chip_gen: v7x
topology: tpu7x:2x2x1
jax: 0.10.0
libtpu: 0.0.40
codegen_flags: <defaults>
</compile_context>

<pallas_src>
import functools

import numpy as np
import jax
import jax.numpy as jnp
from jax.experimental import pallas as pl
from jax.experimental.pallas import tpu as pltpu

F32 = jnp.float32
BF16 = jnp.bfloat16


# ------------------------------------------------------------------ helpers --
def _silu(x):
    return x * (1.0 / (1.0 + jnp.exp(-x)))


def _mdot(a, b):
    """MXU matmul: bf16 operands, f32 accumulation."""
    return jnp.dot(a.astype(BF16), b.astype(BF16), preferred_element_type=F32)


def _scatter_dot(onehot, vals):
    """onehot^T @ vals (contract over rows); dtype of operands preserved, f32 acc."""
    return jax.lax.dot_general(onehot, vals, (((0,), (0,)), ((), ())),
                               preferred_element_type=F32)


def _round_up(x, m):
    return ((x + m - 1) // m) * m


def _full_spec(shape):
    nd = len(shape)
    return pl.BlockSpec(tuple(shape), lambda i, _nd=nd: (0,) * _nd)


# ------------------------------------------------------------------ kernels --
def rep_fused_kernel(x_ref, poscat_ref, eidx_ref,
                     we_ref, be_ref, wmsg_ref, bm_ref, wmd_ref, wc_ref, bc_ref,
                     h_ref, agg_ref, dpos_ref,
                     hbf_ref):
    """Fused clean+perturbed equivariant rep layer, edge-tiled.

    grid = (E_pad // TE,)  — edge->node scatter reduction axis ("arbitrary").
    Resident outputs (constant index maps):
      h_ref    (N, H)    node embedding (written once at t==0)
      agg_ref  (N, 2H)   [agg_clean | agg_noise] message scatter-add (bf16 MXU, f32 acc)
      dpos_ref (N, 3)    noise-branch coordinate update scatter-add (f32 path)
    Scratch: hbf (N, H) bf16 copy of h used as the gather RHS.
    """
    t = pl.program_id(0)
    n_pad = hbf_ref.shape[0]
    hdim = wmd_ref.shape[1]
    tdim = wmsg_ref.shape[0] - 2 * hdim
    te = eidx_ref.shape[0]

    @pl.when(t == 0)
    def _init():
        h0 = _mdot(x_ref[...], we_ref[...]) + be_ref[...]
        h_ref[...] = h0
        hbf_ref[...] = h0.astype(BF16)
        agg_ref[...] = jnp.zeros_like(agg_ref)
        dpos_ref[...] = jnp.zeros_like(dpos_ref)

    # ---------------- per edge tile ----------------
    eidx = eidx_ref[...]                                    # (TE, 3) int32 [src|dst|ety]
    src = eidx[:, 0:1]
    dst = eidx[:, 1:2]
    ety = eidx[:, 2:3]

    # tile-local one-hots (padded edges carry index N_pad -> all-zero rows)
    iota_n = jax.lax.broadcasted_iota(jnp.int32, (te, n_pad), 1)
    sel_src = iota_n == src
    sel_dst = iota_n == dst
    oh_src_bf = sel_src.astype(BF16)
    oh_dst_bf = sel_dst.astype(BF16)
    oh_src_f32 = sel_src.astype(F32)
    oh_diff_f32 = oh_src_f32 - sel_dst.astype(F32)          # {-1, 0, +1}
    oh_ety_bf = (jax.lax.broadcasted_iota(jnp.int32, (te, tdim), 1) == ety).astype(BF16)

    # fused endpoint feature gather: one (2TE, N) @ (N, H) bf16 matmul
    feat2 = jnp.dot(jnp.concatenate([oh_src_bf, oh_dst_bf], axis=0), hbf_ref[...],
                    preferred_element_type=F32)             # (2TE, H)
    xi = feat2[:te]
    xj = feat2[te:]

    # relative positions in f32: (oh_src - oh_dst) @ [pos | ppos] == pos_i - pos_j
    dvec = jnp.dot(oh_diff_f32, poscat_ref[...], preferred_element_type=F32)  # (TE, 6)
    d_o = dvec[:, 0:3]
    d_n = dvec[:, 3:6]
    d2o = jnp.sum(d_o * d_o, axis=-1, keepdims=True)        # (TE, 1)
    d2n = jnp.sum(d_n * d_n, axis=-1, keepdims=True)

    # packed message matmul shared by both branches: [xi | xj | ea] @ [wmi; wmj; wme]
    pre = _mdot(jnp.concatenate([xi.astype(BF16), xj.astype(BF16), oh_ety_bf], axis=-1),
                wmsg_ref[...]) + bm_ref[...]                 # (TE, H)
    wmd = wmd_ref[...]                                       # (1, H)  VPU broadcast
    m_o = _silu(pre + d2o * wmd)
    m_n = _silu(pre + d2n * wmd)

    # coordinate-update coefficient: lane reduction instead of (TE,H)@(H,1) matmul
    coef_n = jnp.sum(m_n * wc_ref[...], axis=-1, keepdims=True) + bc_ref[...]

    # packed edge->node scatter_add: bf16 for messages, f32 for coordinate updates
    msg_pack = jnp.concatenate([m_o.astype(BF16), m_n.astype(BF16)], axis=-1)  # (TE, 2H)
    agg_ref[...] += _scatter_dot(oh_src_bf, msg_pack)                          # (N, 2H)
    dpos_ref[...] += _scatter_dot(oh_src_f32, d_n * coef_n)                    # (N, 3) f32


def dec_loss_kernel(h_ref, agg_ref, dpos_ref, poscat_ref, sig_ref, n2g_ref, lab_ref,
                    wupd_ref, bu_ref, ndw1_ref, ndb1_ref, ndw2_ref, ndb2_ref,
                    npw1_ref, npb1_ref, npw2_ref, npb2_ref,
                    out_ref, accxg_ref, accdl_ref, *, num_graphs):
    """Fused wupd-finalize + node_dec(x2) + graph pooling + denoise L2 + noise-level CE.

    grid = (N_pad // TN,)  — node->graph scatter reduction axis ("arbitrary").
    acc scratch: accxg (G_pad, 2H) = [xg_ori | xg_noise], accdl (G_pad, 1) per-graph L2.
    out (1, 2) = [loss_denoise_mean, loss_pred_noise_mean].
    """
    t = pl.program_id(0)
    nt = pl.num_programs(0)
    g_pad = accxg_ref.shape[0]
    hdim = ndw1_ref.shape[0]
    tn = h_ref.shape[0]

    @pl.when(t == 0)
    def _init():
        accxg_ref[...] = jnp.zeros_like(accxg_ref)
        accdl_ref[...] = jnp.zeros_like(accdl_ref)

    # rep-model node update (both branches row-packed into one pair of matmuls)
    h = h_ref[...]
    agg = agg_ref[...]
    agg_o = agg[:, :hdim]
    agg_n = agg[:, hdim:]
    xin = jnp.concatenate([jnp.concatenate([h, agg_o], axis=-1),
                           jnp.concatenate([h, agg_n], axis=-1)], axis=0)   # (2TN, 2H)
    xl = _silu(_mdot(xin, wupd_ref[...]) + bu_ref[...])                     # (2TN, H)

    # node_dec on both branches (shared weights), still row-packed
    h1 = _silu(_mdot(xl, ndw1_ref[...]) + ndb1_ref[...])
    h2 = _mdot(h1, ndw2_ref[...]) + ndb2_ref[...]                           # (2TN, H)
    h2cat = jnp.concatenate([h2[:tn].astype(BF16), h2[tn:].astype(BF16)],
                            axis=-1)                                        # (TN, 2H) [ori|noise]

    # per-node denoise loss  sum_xyz ((pred_pos - pos)/sigma)^2        (f32 path)
    # (pred_noise - target == (pred_pos - pos)/sigma; the perturbed term cancels)
    poscat = poscat_ref[...]
    pos = poscat[:, 0:3]
    ppos = poscat[:, 3:6]
    pred_pos = ppos + dpos_ref[...]
    inv = 1.0 / sig_ref[...]
    d = (pred_pos - pos) * inv
    sq = jnp.sum(d * d, axis=-1, keepdims=True)                             # (TN, 1)

    # node->graph scatter_add (padded nodes carry graph id == G_pad -> zero rows)
    sel_g = jax.lax.broadcasted_iota(jnp.int32, (tn, g_pad), 1) == n2g_ref[...]
    accxg_ref[...] += _scatter_dot(sel_g.astype(BF16), h2cat)               # (G_pad, 2H)
    accdl_ref[...] += _scatter_dot(sel_g.astype(F32), sq)                   # (G_pad, 1)

    @pl.when(t == nt - 1)
    def _final():
        xg = accxg_ref[...]                               # [graph_rep_ori | graph_rep_noise]
        hp = _silu(_mdot(xg, npw1_ref[...]) + npb1_ref[...])
        logits = _mdot(hp, npw2_ref[...]) + npb2_ref[...]                   # (G_pad, K)
        k = logits.shape[1]
        mx = jnp.max(logits, axis=-1, keepdims=True)
        lse = mx + jnp.log(jnp.sum(jnp.exp(logits - mx), axis=-1, keepdims=True))
        lab_oh = (jax.lax.broadcasted_iota(jnp.int32, (g_pad, k), 1)
                  == lab_ref[...]).astype(F32)
        picked = jnp.sum(logits * lab_oh, axis=-1, keepdims=True)
        ce = lse - picked                                                   # (G_pad, 1)
        valid = (jax.lax.broadcasted_iota(jnp.int32, (g_pad, 1), 0)
                 < num_graphs).astype(F32)
        inv_g = 1.0 / num_graphs
        loss_d = jnp.sum(accdl_ref[...], axis=0, keepdims=True) * inv_g     # (1, 1)
        loss_p = jnp.sum(ce * valid, axis=0, keepdims=True) * inv_g         # (1, 1)
        out_ref[...] = jnp.concatenate([loss_d, loss_p], axis=-1)           # (1, 2)


# ------------------------------------------------------------------- module --
class _NS:
    def __init__(self, **kw):
        self.__dict__.update(kw)


class EquivariantDenoisePredPallas:
    """JAX/Pallas port of EquivariantDenoisePred with a synthetic fused EGNN rep model.

    Supports noise_type='gaussian', pred_mode='force'.
    """

    # edge_tile=256 fits v7x's 64 MiB VMEM; raise to 512-1024 on v5e/v6e (128 MiB).
    def __init__(self, config, key, feat_dim, *, edge_tile=256, node_tile=512):
        assert edge_tile % 8 == 0 and node_tile % 8 == 0
        self.config = config
        self.hidden_dim = config.model.hidden_dim
        self.edge_types = 0 if config.model.no_edge_types else config.model.order + 1
        self.noise_type = config.model.noise_type
        self.pred_mode = config.model.pred_mode
        self.num_noise_level = config.model.num_noise_level
        self.feat_dim = feat_dim
        self.edge_tile = edge_tile
        self.node_tile = node_tile
        self.sigmas = jnp.asarray(
            np.exp(np.linspace(np.log(config.model.sigma_begin),
                               np.log(config.model.sigma_end),
                               config.model.num_noise_level)), dtype=F32)
        self.params = self._init_params(key)

    def _init_params(self, key):
        H = self.hidden_dim
        T = max(self.edge_types, 1)
        K = self.num_noise_level
        Fd = self.feat_dim
        mats = {
            'we': (Fd, H),
            'wmsg': (2 * H + T, H),     # packed [wmi; wmj; wme]
            'wmd': (1, H),
            'wc': (1, H),
            'wupd': (2 * H, H),         # packed [wuh; wua]
            'nd_w1': (H, H), 'nd_w2': (H, H),
            'np_w1': (2 * H, H),        # noise_pred layer 1 on [xg_ori | xg_noise]
            'np_w2': (H, K),
        }
        keys = jax.random.split(key, len(mats))
        p = {}
        for (name, shape), k in zip(mats.items(), keys):
            p[name] = (jax.random.normal(k, shape, F32)
                       / jnp.sqrt(float(shape[0]))).astype(F32)
        zeros = lambda n: jnp.zeros((1, n), F32)
        p.update(be=zeros(H), bm=zeros(H), bc=zeros(1), bu=zeros(H),
                 nd_b1=zeros(H), nd_b2=zeros(H),
                 np_b1=zeros(H), np_b2=zeros(K))
        # TODO(synk): graph_dec (energy head) omitted — its output is unused for
        # pred_mode='force' and does not affect the returned losses.
        return p

    # fused rep model (clean + perturbed branch), edge-tiled
    def _rep_call(self, x, poscat, eidx, n_pad, e_pad, te):
        p = self.params
        H = self.hidden_dim
        Fd = self.feat_dim
        out_shape = (jax.ShapeDtypeStruct((n_pad, H), F32),
                     jax.ShapeDtypeStruct((n_pad, 2 * H), F32),
                     jax.ShapeDtypeStruct((n_pad, 3), F32))
        fn = pl.pallas_call(
            rep_fused_kernel,
            grid=(e_pad // te,),
            in_specs=[
                _full_spec((n_pad, Fd)),
                _full_spec((n_pad, 6)),
                pl.BlockSpec((te, 3), lambda i: (i, 0)),        # packed [src|dst|ety]
                _full_spec(p['we'].shape), _full_spec(p['be'].shape),
                _full_spec(p['wmsg'].shape), _full_spec(p['bm'].shape),
                _full_spec(p['wmd'].shape),
                _full_spec(p['wc'].shape), _full_spec(p['bc'].shape),
            ],
            out_specs=(_full_spec((n_pad, H)), _full_spec((n_pad, 2 * H)),
                       _full_spec((n_pad, 3))),
            out_shape=out_shape,
            scratch_shapes=[pltpu.VMEM((n_pad, H), BF16)],
            compiler_params=pltpu.CompilerParams(
                dimension_semantics=("arbitrary",),
                vmem_limit_bytes=64 * 1024 * 1024),
        )
        return fn(x, poscat, eidx, p['we'], p['be'], p['wmsg'], p['bm'], p['wmd'],
                  p['wc'], p['bc'])

    # fused wupd finalize + node_dec x2 + pooling + denoise L2 + CE, node-tiled
    def _dec_loss_call(self, h, agg, dpos, poscat, sig, n2g, labels,
                       g, g_pad, n_pad, tn):
        p = self.params
        H = self.hidden_dim
        K = self.num_noise_level
        row = lambda w: pl.BlockSpec((tn, w), lambda i: (i, 0))
        kern = functools.partial(dec_loss_kernel, num_graphs=g)
        fn = pl.pallas_call(
            kern,
            grid=(n_pad // tn,),
            in_specs=[
                row(H), row(2 * H), row(3), row(6), row(1), row(1),
                _full_spec((g_pad, 1)),
                _full_spec((2 * H, H)), _full_spec((1, H)),
                _full_spec((H, H)), _full_spec((1, H)),
                _full_spec((H, H)), _full_spec((1, H)),
                _full_spec((2 * H, H)), _full_spec((1, H)),
                _full_spec((H, K)), _full_spec((1, K)),
            ],
            out_specs=_full_spec((1, 2)),
            out_shape=jax.ShapeDtypeStruct((1, 2), F32),
            scratch_shapes=[pltpu.VMEM((g_pad, 2 * H), F32),
                            pltpu.VMEM((g_pad, 1), F32)],
            compiler_params=pltpu.CompilerParams(
                dimension_semantics=("arbitrary",),
                vmem_limit_bytes=64 * 1024 * 1024),
        )
        return fn(h, agg, dpos, poscat, sig, n2g, labels,
                  p['wupd'], p['bu'],
                  p['nd_w1'], p['nd_b1'], p['nd_w2'], p['nd_b2'],
                  p['np_w1'], p['np_b1'], p['np_w2'], p['np_b2'])

    def forward(self, data, key):
        x = data['node_feature'].astype(F32)
        pos = data['pos'].astype(F32)
        edge_index = data['edge_index'].astype(jnp.int32)
        edge_type = data['edge_type'].astype(jnp.int32)
        n2g = data['batch'].astype(jnp.int32)
        G = int(data['num_graphs'])
        N = pos.shape[0]
        E = edge_index.shape[1]
        K = self.num_noise_level

        # noise-level sampling + gaussian perturbation (host-side RNG glue)
        k_lvl, k_noise = jax.random.split(key)
        noise_level = jax.random.randint(k_lvl, (G,), 0, K)
        used_sigmas = self.sigmas[noise_level][n2g][:, None]                 # (N, 1)
        # TODO(synk): riemann / kabsch perturbation (torch.svd based) not implemented.
        perturbed_pos = pos + jax.random.normal(k_noise, pos.shape, F32) * used_sigmas

        # pad nodes / edges / graphs to tile multiples; invalid indices (=N_pad / =G_pad)
        # give all-zero one-hot rows inside the kernels, so padding contributes nothing.
        tn = min(self.node_tile, _round_up(N, 8))
        n_pad = _round_up(N, tn)
        te = min(self.edge_tile, _round_up(E, 8))
        e_pad = _round_up(E, te)
        g_pad = max(8, _round_up(G, 8))

        pn = n_pad - N
        x_p = jnp.pad(x, ((0, pn), (0, 0)))
        poscat = jnp.concatenate([jnp.pad(pos, ((0, pn), (0, 0))),
                                  jnp.pad(perturbed_pos, ((0, pn), (0, 0)))], axis=-1)
        sig_p = jnp.pad(used_sigmas, ((0, pn), (0, 0)), constant_values=1.0)
        n2g_p = jnp.pad(n2g, ((0, pn),), constant_values=g_pad)[:, None]

        pe = e_pad - E
        eidx = jnp.stack([jnp.pad(edge_index[0], (0, pe), constant_values=n_pad),
                          jnp.pad(edge_index[1], (0, pe), constant_values=n_pad),
                          jnp.pad(edge_type, (0, pe), constant_values=0)],
                         axis=1).astype(jnp.int32)                           # (E_pad, 3)

        labels = jnp.pad(noise_level, (0, g_pad - G))[:, None].astype(jnp.int32)

        # fused rep model: clean + perturbed branch in one edge-tiled kernel
        h, agg, dpos = self._rep_call(x_p, poscat, eidx, n_pad, e_pad, te)

        # pred_mode == 'force': pred_noise = (pred_pos - perturbed_pos) / sigma
        # TODO(synk): pred_mode == 'energy' (autograd force from energy) not implemented.
        losses = self._dec_loss_call(h, agg, dpos, poscat, sig_p, n2g_p, labels,
                                     G, g_pad, n_pad, tn)
        return losses[0, 0], losses[0, 1]


# --------------------------------------------------------------------- main --
if __name__ == "__main__":
    CONFIG = _NS(
        model=_NS(hidden_dim=32, num_noise_level=10, sigma_begin=10.0, sigma_end=0.01,
                  order=2, no_edge_types=False, noise_type='gaussian', pred_mode='force'),
        train=_NS(steps=1),
    )

    key = jax.random.PRNGKey(0)
    k_data, k_param, k_fwd = jax.random.split(key, 3)

    Fd, N, G = 8, 16, 2
    npg = N // G
    # small tiles so the multi-tile accumulator/finalize path is exercised at toy size
    model = EquivariantDenoisePredPallas(CONFIG, k_param, feat_dim=Fd,
                                         edge_tile=16, node_tile=8)

    node_feature = jax.random.normal(jax.random.fold_in(k_data, 0), (N, Fd), F32)
    pos = jax.random.normal(jax.random.fold_in(k_data, 1), (N, 3), F32)
    batch = jnp.repeat(jnp.arange(G, dtype=jnp.int32), npg)

    src, dst = [], []
    for g in range(G):
        base = g * npg
        for i in range(npg):
            a, b = base + i, base + (i + 1) % npg
            src += [a, b]
            dst += [b, a]
    edge_index = jnp.asarray([src, dst], dtype=jnp.int32)
    E = edge_index.shape[1]
    edge_type = jax.random.randint(jax.random.fold_in(k_data, 2), (E,), 0,
                                   CONFIG.model.order + 1)

    data = dict(node_feature=node_feature, pos=pos, edge_index=edge_index,
                edge_type=edge_type, batch=batch, num_graphs=G)

    loss_denoise, loss_pred_noise = model.forward(data, k_fwd)
    jax.block_until_ready((loss_denoise, loss_pred_noise))
    assert bool(jnp.isfinite(loss_denoise)) and bool(jnp.isfinite(loss_pred_noise))
    print("KERNEL_OK")
</pallas_src>

<mosaic_0001>
module attributes {stable_mosaic.version = 11 : i64} {
  func.func @rep_fused_kernel(%arg0: i32, %arg1: memref<16x8xf32, #tpu.memory_space<vmem>>, %arg2: memref<16x6xf32, #tpu.memory_space<vmem>>, %arg3: memref<16x3xi32, #tpu.memory_space<vmem>>, %arg4: memref<8x32xf32, #tpu.memory_space<vmem>>, %arg5: memref<1x32xf32, #tpu.memory_space<vmem>>, %arg6: memref<67x32xf32, #tpu.memory_space<vmem>>, %arg7: memref<1x32xf32, #tpu.memory_space<vmem>>, %arg8: memref<1x32xf32, #tpu.memory_space<vmem>>, %arg9: memref<1x32xf32, #tpu.memory_space<vmem>>, %arg10: memref<1x1xf32, #tpu.memory_space<vmem>>, %arg11: memref<16x32xf32, #tpu.memory_space<vmem>>, %arg12: memref<16x64xf32, #tpu.memory_space<vmem>>, %arg13: memref<16x3xf32, #tpu.memory_space<vmem>>, %arg14: memref<16x32xbf16, #tpu.memory_space<vmem>>) attributes {dimension_semantics = [#tpu.dimension_semantics<arbitrary>], iteration_bounds = array<i64: 2>, scalar_prefetch = 0 : i64, scratch_operands = 1 : i64, tpu.core_type = #tpu.core_type<tc>, window_params = [{pipeline_mode = #tpu.pipeline_mode<synchronous>, transform_indices = @transform_0, window_bounds = array<i64: 16, 8>}, {pipeline_mode = #tpu.pipeline_mode<synchronous>, transform_indices = @transform_1, window_bounds = array<i64: 16, 6>}, {transform_indices = @transform_2, window_bounds = array<i64: 16, 3>}, {pipeline_mode = #tpu.pipeline_mode<synchronous>, transform_indices = @transform_3, window_bounds = array<i64: 8, 32>}, {pipeline_mode = #tpu.pipeline_mode<synchronous>, transform_indices = @transform_4, window_bounds = array<i64: 1, 32>}, {pipeline_mode = #tpu.pipeline_mode<synchronous>, transform_indices = @transform_5, window_bounds = array<i64: 67, 32>}, {pipeline_mode = #tpu.pipeline_mode<synchronous>, transform_indices = @transform_6, window_bounds = array<i64: 1, 32>}, {pipeline_mode = #tpu.pipeline_mode<synchronous>, transform_indices = @transform_7, window_bounds = array<i64: 1, 32>}, {pipeline_mode = #tpu.pipeline_mode<synchronous>, transform_indices = @transform_8, window_bounds = array<i64: 1, 32>}, {pipeline_mode = #tpu.pipeline_mode<synchronous>, transform_indices = @transform_9, window_bounds = array<i64: 1, 1>}, {pipeline_mode = #tpu.pipeline_mode<synchronous>, transform_indices = @transform_10, window_bounds = array<i64: 16, 32>}, {pipeline_mode = #tpu.pipeline_mode<synchronous>, transform_indices = @transform_11, window_bounds = array<i64: 16, 64>}, {pipeline_mode = #tpu.pipeline_mode<synchronous>, transform_indices = @transform_12, window_bounds = array<i64: 16, 3>}]} {
    %c0_i32 = arith.constant 0 : i32
    %0 = arith.cmpi eq, %arg0, %c0_i32 : i32
    %1 = arith.extui %0 : i1 to i32
    %c0_i32_0 = arith.constant 0 : i32
    %2 = arith.cmpi ne, %1, %c0_i32_0 : i32
    scf.if %2 {
      %c0_37 = arith.constant 0 : index
      %c0_38 = arith.constant 0 : index
      %99 = vector.load %arg1[%c0_37, %c0_38] : memref<16x8xf32, #tpu.memory_space<vmem>>, vector<16x8xf32>
      %c0_39 = arith.constant 0 : index
      %c0_40 = arith.constant 0 : index
      %100 = vector.load %arg4[%c0_39, %c0_40] : memref<8x32xf32, #tpu.memory_space<vmem>>, vector<8x32xf32>
      %101 = arith.truncf %99 : vector<16x8xf32> to vector<16x8xbf16>
      %102 = arith.truncf %100 : vector<8x32xf32> to vector<8x32xbf16>
      %cst_41 = arith.constant dense<0.000000e+00> : vector<16x32xf32>
      %103 = tpu.matmul %101, %102, %cst_41 {dimension_numbers = #tpu.dot_dimension_numbers<[1], [0], [0], [1], [0, 0, 1, 1], [], []>} : vector<16x8xbf16>, vector<8x32xbf16>, vector<16x32xf32> -> vector<16x32xf32>
      %c0_42 = arith.constant 0 : index
      %c0_43 = arith.constant 0 : index
      %104 = vector.load %arg5[%c0_42, %c0_43] : memref<1x32xf32, #tpu.memory_space<vmem>>, vector<1x32xf32>
      %105 = vector.broadcast %104 : vector<1x32xf32> to vector<16x32xf32>
      %106 = arith.addf %103, %105 : vector<16x32xf32>
      %c0_44 = arith.constant 0 : index
      %c0_45 = arith.constant 0 : index
      %107 = vector.load %arg11[%c0_44, %c0_45] : memref<16x32xf32, #tpu.memory_space<vmem>>, vector<16x32xf32>
      tpu.vector_store %arg11[%c0_44, %c0_45], %106 {strides = array<i32>} : memref<16x32xf32, #tpu.memory_space<vmem>>, vector<16x32xf32>,
      %108 = arith.truncf %106 : vector<16x32xf32> to vector<16x32xbf16>
      %c0_46 = arith.constant 0 : index
      %c0_47 = arith.constant 0 : index
      %109 = vector.load %arg14[%c0_46, %c0_47] : memref<16x32xbf16, #tpu.memory_space<vmem>>, vector<16x32xbf16>
      tpu.vector_store %arg14[%c0_46, %c0_47], %108 {strides = array<i32>} : memref<16x32xbf16, #tpu.memory_space<vmem>>, vector<16x32xbf16>,
      %cst_48 = arith.constant 0.000000e+00 : f32
      %110 = vector.broadcast %cst_48 : f32 to vector<16x64xf32>
      %c0_49 = arith.constant 0 : index
      %c0_50 = arith.constant 0 : index
      %111 = vector.load %arg12[%c0_49, %c0_50] : memref<16x64xf32, #tpu.memory_space<vmem>>, vector<16x64xf32>
      tpu.vector_store %arg12[%c0_49, %c0_50], %110 {strides = array<i32>} : memref<16x64xf32, #tpu.memory_space<vmem>>, vector<16x64xf32>,
      %cst_51 = arith.constant 0.000000e+00 : f32
      %112 = vector.broadcast %cst_51 : f32 to vector<16x3xf32>
      %c0_52 = arith.constant 0 : index
      %c0_53 = arith.constant 0 : index
      %113 = vector.load %arg13[%c0_52, %c0_53] : memref<16x3xf32, #tpu.memory_space<vmem>>, vector<16x3xf32>
      tpu.vector_store %arg13[%c0_52, %c0_53], %112 {strides = array<i32>} : memref<16x3xf32, #tpu.memory_space<vmem>>, vector<16x3xf32>,
    } else {
    }
    %c0 = arith.constant 0 : index
    %c0_1 = arith.constant 0 : index
    %3 = vector.load %arg3[%c0, %c0_1] : memref<16x3xi32, #tpu.memory_space<vmem>>, vector<16x3xi32>
    %4 = vector.extract_strided_slice %3 {offsets = [0, 0], sizes = [16, 1], strides = [1, 1]} : vector<16x3xi32> to vector<16x1xi32>
    %5 = vector.extract_strided_slice %3 {offsets = [0, 1], sizes = [16, 1], strides = [1, 1]} : vector<16x3xi32> to vector<16x1xi32>
    %6 = vector.extract_strided_slice %3 {offsets = [0, 2], sizes = [16, 1], strides = [1, 1]} : vector<16x3xi32> to vector<16x1xi32>
    %7 = tpu.iota {dimensions = array<i32: 1>} : vector<16x16xi32>
    %8 = vector.broadcast %4 : vector<16x1xi32> to vector<16x16xi32>
    %9 = arith.cmpi eq, %7, %8 : vector<16x16xi32>
    %10 = vector.broadcast %5 : vector<16x1xi32> to vector<16x16xi32>
    %11 = arith.cmpi eq, %7, %10 : vector<16x16xi32>
    %12 = arith.extui %9 : vector<16x16xi1> to vector<16x16xi32>
    %13 = arith.sitofp %12 : vector<16x16xi32> to vector<16x16xf32>
    %14 = arith.truncf %13 : vector<16x16xf32> to vector<16x16xbf16>
    %15 = arith.extui %11 : vector<16x16xi1> to vector<16x16xi32>
    %16 = arith.sitofp %15 : vector<16x16xi32> to vector<16x16xf32>
    %17 = arith.truncf %16 : vector<16x16xf32> to vector<16x16xbf16>
    %18 = arith.extui %9 : vector<16x16xi1> to vector<16x16xi32>
    %19 = arith.sitofp %18 : vector<16x16xi32> to vector<16x16xf32>
    %20 = arith.extui %11 : vector<16x16xi1> to vector<16x16xi32>
    %21 = arith.sitofp %20 : vector<16x16xi32> to vector<16x16xf32>
    %22 = arith.subf %19, %21 : vector<16x16xf32>
    %23 = tpu.iota {dimensions = array<i32: 1>} : vector<16x3xi32>
    %24 = vector.broadcast %6 : vector<16x1xi32> to vector<16x3xi32>
    %25 = arith.cmpi eq, %23, %24 : vector<16x3xi32>
    %26 = arith.extui %25 : vector<16x3xi1> to vector<16x3xi32>
    %27 = arith.sitofp %26 : vector<16x3xi32> to vector<16x3xf32>
    %28 = arith.truncf %27 : vector<16x3xf32> to vector<16x3xbf16>
    %29 = tpu.concatenate %14, %17 in 0 : vector<16x16xbf16>, vector<16x16xbf16> -> vector<32x16xbf16>
    %c0_2 = arith.constant 0 : index
    %c0_3 = arith.constant 0 : index
    %30 = vector.load %arg14[%c0_2, %c0_3] : memref<16x32xbf16, #tpu.memory_space<vmem>>, vector<16x32xbf16>
    %cst = arith.constant dense<0.000000e+00> : vector<32x32xf32>
    %31 = tpu.matmul %29, %30, %cst {dimension_numbers = #tpu.dot_dimension_numbers<[1], [0], [0], [1], [0, 0, 1, 1], [], []>} : vector<32x16xbf16>, vector<16x32xbf16>, vector<32x32xf32> -> vector<32x32xf32>
    %32 = vector.extract_strided_slice %31 {offsets = [0, 0], sizes = [16, 32], strides = [1, 1]} : vector<32x32xf32> to vector<16x32xf32>
    %33 = vector.extract_strided_slice %31 {offsets = [16, 0], sizes = [16, 32], strides = [1, 1]} : vector<32x32xf32> to vector<16x32xf32>
    %c0_4 = arith.constant 0 : index
    %c0_5 = arith.constant 0 : index
    %34 = vector.load %arg2[%c0_4, %c0_5] : memref<16x6xf32, #tpu.memory_space<vmem>>, vector<16x6xf32>
    %cst_6 = arith.constant dense<0.000000e+00> : vector<16x6xf32>
    %35 = tpu.matmul %22, %34, %cst_6 {dimension_numbers = #tpu.dot_dimension_numbers<[1], [0], [0], [1], [0, 0, 1, 1], [], []>} : vector<16x16xf32>, vector<16x6xf32>, vector<16x6xf32> -> vector<16x6xf32>
    %36 = vector.extract_strided_slice %35 {offsets = [0, 0], sizes = [16, 3], strides = [1, 1]} : vector<16x6xf32> to vector<16x3xf32>
    %37 = vector.extract_strided_slice %35 {offsets = [0, 3], sizes = [16, 3], strides = [1, 1]} : vector<16x6xf32> to vector<16x3xf32>
    %38 = arith.mulf %36, %36 : vector<16x3xf32>
    %cst_7 = arith.constant dense<0.000000e+00> : vector<16xf32>
    %39 = vector.multi_reduction <add>, %38, %cst_7 [1] : vector<16x3xf32> to vector<16xf32>
    %40 = vector.shape_cast %39 : vector<16xf32> to vector<16x1xf32>
    %41 = arith.mulf %37, %37 : vector<16x3xf32>
    %cst_8 = arith.constant dense<0.000000e+00> : vector<16xf32>
    %42 = vector.multi_reduction <add>, %41, %cst_8 [1] : vector<16x3xf32> to vector<16xf32>
    %43 = vector.shape_cast %42 : vector<16xf32> to vector<16x1xf32>
    %44 = arith.truncf %32 : vector<16x32xf32> to vector<16x32xbf16>
    %45 = arith.truncf %33 : vector<16x32xf32> to vector<16x32xbf16>
    %46 = tpu.concatenate %44, %45, %28 in 1 : vector<16x32xbf16>, vector<16x32xbf16>, vector<16x3xbf16> -> vector<16x67xbf16>
    %c0_9 = arith.constant 0 : index
    %c0_10 = arith.constant 0 : index
    %47 = vector.load %arg6[%c0_9, %c0_10] : memref<67x32xf32, #tpu.memory_space<vmem>>, vector<67x32xf32>
    %48 = arith.truncf %47 : vector<67x32xf32> to vector<67x32xbf16>
    %cst_11 = arith.constant dense<0.000000e+00> : vector<16x32xf32>
    %49 = tpu.matmul %46, %48, %cst_11 {dimension_numbers = #tpu.dot_dimension_numbers<[1], [0], [0], [1], [0, 0, 1, 1], [], []>} : vector<16x67xbf16>, vector<67x32xbf16>, vector<16x32xf32> -> vector<16x32xf32>
    %c0_12 = arith.constant 0 : index
    %c0_13 = arith.constant 0 : index
    %50 = vector.load %arg7[%c0_12, %c0_13] : memref<1x32xf32, #tpu.memory_space<vmem>>, vector<1x32xf32>
    %51 = vector.broadcast %50 : vector<1x32xf32> to vector<16x32xf32>
    %52 = arith.addf %49, %51 : vector<16x32xf32>
    %c0_14 = arith.constant 0 : index
    %c0_15 = arith.constant 0 : index
    %53 = vector.load %arg8[%c0_14, %c0_15] : memref<1x32xf32, #tpu.memory_space<vmem>>, vector<1x32xf32>
    %54 = vector.broadcast %40 : vector<16x1xf32> to vector<16x32xf32>
    %55 = vector.broadcast %53 : vector<1x32xf32> to vector<16x32xf32>
    %56 = arith.mulf %54, %55 : vector<16x32xf32>
    %57 = arith.addf %52, %56 : vector<16x32xf32>
    %cst_16 = arith.constant 0.000000e+00 : f32
    %58 = vector.broadcast %cst_16 : f32 to vector<16x32xf32>
    %59 = arith.subf %58, %57 : vector<16x32xf32>
    %60 = math.exp %59 : vector<16x32xf32>
    %cst_17 = arith.constant 1.000000e+00 : f32
    %61 = vector.broadcast %cst_17 : f32 to vector<16x32xf32>
    %62 = arith.addf %61, %60 : vector<16x32xf32>
    %cst_18 = arith.constant 1.000000e+00 : f32
    %63 = vector.broadcast %cst_18 : f32 to vector<16x32xf32>
    %64 = arith.divf %63, %62 : vector<16x32xf32>
    %65 = arith.mulf %57, %64 : vector<16x32xf32>
    %66 = vector.broadcast %43 : vector<16x1xf32> to vector<16x32xf32>
    %67 = vector.broadcast %53 : vector<1x32xf32> to vector<16x32xf32>
    %68 = arith.mulf %66, %67 : vector<16x32xf32>
    %69 = arith.addf %52, %68 : vector<16x32xf32>
    %cst_19 = arith.constant 0.000000e+00 : f32
    %70 = vector.broadcast %cst_19 : f32 to vector<16x32xf32>
    %71 = arith.subf %70, %69 : vector<16x32xf32>
    %72 = math.exp %71 : vector<16x32xf32>
    %cst_20 = arith.constant 1.000000e+00 : f32
    %73 = vector.broadcast %cst_20 : f32 to vector<16x32xf32>
    %74 = arith.addf %73, %72 : vector<16x32xf32>
    %cst_21 = arith.constant 1.000000e+00 : f32
    %75 = vector.broadcast %cst_21 : f32 to vector<16x32xf32>
    %76 = arith.divf %75, %74 : vector<16x32xf32>
    %77 = arith.mulf %69, %76 : vector<16x32xf32>
    %c0_22 = arith.constant 0 : index
    %c0_23 = arith.constant 0 : index
    %78 = vector.load %arg9[%c0_22, %c0_23] : memref<1x32xf32, #tpu.memory_space<vmem>>, vector<1x32xf32>
    %79 = vector.broadcast %78 : vector<1x32xf32> to vector<16x32xf32>
    %80 = arith.mulf %77, %79 : vector<16x32xf32>
    %cst_24 = arith.constant dense<0.000000e+00> : vector<16xf32>
    %81 = vector.multi_reduction <add>, %80, %cst_24 [1] : vector<16x32xf32> to vector<16xf32>
    %82 = vector.shape_cast %81 : vector<16xf32> to vector<16x1xf32>
    %c0_25 = arith.constant 0 : index
    %c0_26 = arith.constant 0 : index
    %83 = vector.load %arg10[%c0_25, %c0_26] : memref<1x1xf32, #tpu.memory_space<vmem>>, vector<1x1xf32>
    %84 = vector.broadcast %83 : vector<1x1xf32> to vector<16x1xf32>
    %85 = arith.addf %82, %84 : vector<16x1xf32>
    %86 = arith.truncf %65 : vector<16x32xf32> to vector<16x32xbf16>
    %87 = arith.truncf %77 : vector<16x32xf32> to vector<16x32xbf16>
    %88 = tpu.concatenate %86, %87 in 1 : vector<16x32xbf16>, vector<16x32xbf16> -> vector<16x64xbf16>
    %c0_27 = arith.constant 0 : index
    %c0_28 = arith.constant 0 : index
    %89 = vector.load %arg12[%c0_27, %c0_28] : memref<16x64xf32, #tpu.memory_space<vmem>>, vector<16x64xf32>
    %cst_29 = arith.constant dense<0.000000e+00> : vector<16x64xf32>
    %90 = tpu.matmul %14, %88, %cst_29 {dimension_numbers = #tpu.dot_dimension_numbers<[0], [0], [1], [1], [0, 1, 1, 1], [], []>} : vector<16x16xbf16>, vector<16x64xbf16>, vector<16x64xf32> -> vector<16x64xf32>
    %91 = arith.addf %89, %90 : vector<16x64xf32>
    %c0_30 = arith.constant 0 : index
    %c0_31 = arith.constant 0 : index
    %92 = vector.load %arg12[%c0_30, %c0_31] : memref<16x64xf32, #tpu.memory_space<vmem>>, vector<16x64xf32>
    tpu.vector_store %arg12[%c0_30, %c0_31], %91 {strides = array<i32>} : memref<16x64xf32, #tpu.memory_space<vmem>>, vector<16x64xf32>,
    %c0_32 = arith.constant 0 : index
    %c0_33 = arith.constant 0 : index
    %93 = vector.load %arg13[%c0_32, %c0_33] : memref<16x3xf32, #tpu.memory_space<vmem>>, vector<16x3xf32>
    %94 = vector.broadcast %85 : vector<16x1xf32> to vector<16x3xf32>
    %95 = arith.mulf %37, %94 : vector<16x3xf32>
    %cst_34 = arith.constant dense<0.000000e+00> : vector<16x3xf32>
    %96 = tpu.matmul %19, %95, %cst_34 {dimension_numbers = #tpu.dot_dimension_numbers<[0], [0], [1], [1], [0, 1, 1, 1], [], []>} : vector<16x16xf32>, vector<16x3xf32>, vector<16x3xf32> -> vector<16x3xf32>
    %97 = arith.addf %93, %96 : vector<16x3xf32>
    %c0_35 = arith.constant 0 : index
    %c0_36 = arith.constant 0 : index
    %98 = vector.load %arg13[%c0_35, %c0_36] : memref<16x3xf32, #tpu.memory_space<vmem>>, vector<16x3xf32>
    tpu.vector_store %arg13[%c0_35, %c0_36], %97 {strides = array<i32>} : memref<16x3xf32, #tpu.memory_space<vmem>>, vector<16x3xf32>,
    return
  }
  func.func @transform_0(%arg0: i32) -> (i32, i32) {
    %c0_i32 = arith.constant 0 : i32
    %c0_i32_0 = arith.constant 0 : i32
    %c0_i32_1 = arith.constant 0 : i32
    return %c0_i32, %c0_i32_0 : i32, i32
  }
  func.func @transform_1(%arg0: i32) -> (i32, i32) {
    %c0_i32 = arith.constant 0 : i32
    %c0_i32_0 = arith.constant 0 : i32
    %c0_i32_1 = arith.constant 0 : i32
    return %c0_i32, %c0_i32_0 : i32, i32
  }
  func.func @transform_2(%arg0: i32) -> (i32, i32) {
    %c0_i32 = arith.constant 0 : i32
    %c0_i32_0 = arith.constant 0 : i32
    return %arg0, %c0_i32 : i32, i32
  }
  func.func @transform_3(%arg0: i32) -> (i32, i32) {
    %c0_i32 = arith.constant 0 : i32
    %c0_i32_0 = arith.constant 0 : i32
    %c0_i32_1 = arith.constant 0 : i32
    return %c0_i32, %c0_i32_0 : i32, i32
  }
  func.func @transform_4(%arg0: i32) -> (i32, i32) {
    %c0_i32 = arith.constant 0 : i32
    %c0_i32_0 = arith.constant 0 : i32
    %c0_i32_1 = arith.constant 0 : i32
    return %c0_i32, %c0_i32_0 : i32, i32
  }
  func.func @transform_5(%arg0: i32) -> (i32, i32) {
    %c0_i32 = arith.constant 0 : i32
    %c0_i32_0 = arith.constant 0 : i32
    %c0_i32_1 = arith.constant 0 : i32
    return %c0_i32, %c0_i32_0 : i32, i32
  }
  func.func @transform_6(%arg0: i32) -> (i32, i32) {
    %c0_i32 = arith.constant 0 : i32
    %c0_i32_0 = arith.constant 0 : i32
    %c0_i32_1 = arith.constant 0 : i32
    return %c0_i32, %c0_i32_0 : i32, i32
  }
  func.func @transform_7(%arg0: i32) -> (i32, i32) {
    %c0_i32 = arith.constant 0 : i32
    %c0_i32_0 = arith.constant 0 : i32
    %c0_i32_1 = arith.constant 0 : i32
    return %c0_i32, %c0_i32_0 : i32, i32
  }
  func.func @transform_8(%arg0: i32) -> (i32, i32) {
    %c0_i32 = arith.constant 0 : i32
    %c0_i32_0 = arith.constant 0 : i32
    %c0_i32_1 = arith.constant 0 : i32
    return %c0_i32, %c0_i32_0 : i32, i32
  }
  func.func @transform_9(%arg0: i32) -> (i32, i32) {
    %c0_i32 = arith.constant 0 : i32
    %c0_i32_0 = arith.constant 0 : i32
    %c0_i32_1 = arith.constant 0 : i32
    return %c0_i32, %c0_i32_0 : i32, i32
  }
  func.func @transform_10(%arg0: i32) -> (i32, i32) {
    %c0_i32 = arith.constant 0 : i32
    %c0_i32_0 = arith.constant 0 : i32
    %c0_i32_1 = arith.constant 0 : i32
    return %c0_i32, %c0_i32_0 : i32, i32
  }
  func.func @transform_11(%arg0: i32) -> (i32, i32) {
    %c0_i32 = arith.constant 0 : i32
    %c0_i32_0 = arith.constant 0 : i32
    %c0_i32_1 = arith.constant 0 : i32
    return %c0_i32, %c0_i32_0 : i32, i32
  }
  func.func @transform_12(%arg0: i32) -> (i32, i32) {
    %c0_i32 = arith.constant 0 : i32
    %c0_i32_0 = arith.constant 0 : i32
    %c0_i32_1 = arith.constant 0 : i32
    return %c0_i32, %c0_i32_0 : i32, i32
  }
}

</mosaic_0001>

<bundles_post_ra>
// kernel: tpu_custom_call.1
= control target key start
LH: loop header
LB: loop body
LE: loop exit
PB: predicated region body
PF: predicated region fallthrough
CT: control target
= control target key end

     0   :  { %s2654_s0 = inlined_call_operand.hbm [shape: f32[16,8], index: 0, kind: input, shape index: {}]   ;;  %s2655_s1 = inlined_call_operand.hbm [shape: f32[16,6], index: 1, kind: input, shape index: {}]   ;;  %s2656_s2 = inlined_call_operand.hbm [shape: s32[32,3], index: 2, kind: input, shape index: {}]   ;;  %s2657_s3 = inlined_call_operand.hbm [shape: f32[8,32], index: 3, kind: input, shape index: {}]   ;;  %s2658_s4 = inlined_call_operand.hbm [shape: f32[1,32], index: 4, kind: input, shape index: {}]   ;;  %s2659_s5 = inlined_call_operand.hbm [shape: f32[67,32], index: 5, kind: input, shape index: {}]   ;;  %s2660_s6 = inlined_call_operand.hbm [shape: f32[1,32], index: 6, kind: input, shape index: {}]   ;;  %s2661_s7 = inlined_call_operand.hbm [shape: f32[1,32], index: 7, kind: input, shape index: {}]   ;;  %s2662_s8 = inlined_call_operand.hbm [shape: f32[1,32], index: 8, kind: input, shape index: {}]   ;;  %s2663_s9 = inlined_call_operand.<no memory space> [shape: f32[1,1], index: 9, kind: input, shape index: {}]   ;;  %s2664_s10 = inlined_call_operand.hbm [shape: f32[16,32], index: 10, kind: output, shape index: {0}]   ;;  %s2665_s11 = inlined_call_operand.hbm [shape: f32[16,64], index: 11, kind: output, shape index: {1}]   ;;  %s2666_s12 = inlined_call_operand.hbm [shape: f32[16,3], index: 12, kind: output, shape index: {2}]  }
   0x1   :  { %2674 = sst [smem:[#allocation32_spill]] %s2664_s10  ;;  %v18_v0 = vstv %s2663_s9 }
   0x2   :  { %2675 = sst [smem:[#allocation33_spill]] %s2665_s11  ;;  %19 = vst [vmem:[#allocation3] sm:$0x1] %v18_v0 }
   0x3   :  { %2676 = sst [smem:[#allocation34_spill]] %s2666_s12 }
   0x4   :  { %20 = vsyncpa [#allocation5], 0 }
   0x5   :  { %21 = vsyncpa [#allocation8], 0 }
   0x6   :  { %22 = vsyncpa [#allocation12], 0 }
   0x7   :  { %23 = vsyncpa [#allocation15], 0 }
   0x8   :  { %24 = vsyncpa [#allocation18], 0 }
   0x9   :  { %25 = vsyncpa [#allocation6], 0 }
   0xa   :  { %26 = vsyncpa [#allocation21], 0  ;;  %s2165_s23 = smov 0   ;;  %s2167_s24 = smov 0  }
   0xb   :  { %s2169_s25 = smov 0   ;;  %s2171_s26 = smov 0  }
   0xc LB: > { %s2070_s9 = smov [#allocation4]   ;;  %s2186_s28 = sadd.s32 4294967295, %s2068_s26   ;;  %s2068_s26 = sphi %s2171_s26, %s2704_s26   ;;  %s2064_s25 = sphi %s2169_s25, %s2703_s25   ;;  %s2060_s24 = sphi %s2167_s24, %s2702_s24   ;;  %s2056_s23 = sphi %s2165_s23, %s2701_s23  }
   0xd   : > { %s327_s27 = sshll.u32 %s2070_s9, 4  ;;  %p1359_p0 = scmp.ge.s32.totalorder %s2068_s26, 1  ;;  %s2192_s27 = int_to_ptr.vmem [resolvable:$true] %s327_s27 }
   0xe   : > { %p2672_p1 = scmp.eq.s32.totalorder %s2186_s28, 0  ;;  %p315_p2 = scmp.lt.s32.totalorder %s2068_s26, 3 }
   0xf   : > { %s2071_s30 = smov [#allocation7]   ;;  %s2072_s15 = smov [#allocation11]  }
  0x10   : > { %p2194_p4 = pnand %p1359_p0, %p315_p2  ;;  %s340_s13 = sshll.u32 %s2071_s30, 4  ;;  %s2206_s13 = int_to_ptr.vmem [resolvable:$true] %s340_s13 }
  0x11   : > { %s365_s16 = sshll.u32 %s2072_s15, 4  ;;  %s1670_s19 = scalar_lea.hbm %s2654_s0, 256  ;;  %s2208_s16 = int_to_ptr.vmem [resolvable:$true] %s365_s16 }
  0x12   : > { %s2677_s29 = scalar_select %p2194_p4, 1, 0 }
  0x13   : > { %p1533_p5 = pneg %p2194_p4  ;;  %p1671_p7 = scmp.ne.s32.totalorder %s2654_s0, %s1670_s19 }
  0x14   : > { %p1677_p11 = scmp.lt.u32.totalorder %s1670_s19, %s2654_s0 }
  0x15   : > { %p2202_p6 = pnand %p1533_p5, %p2672_p1 }
  0x17   : > { %p2218_p8 = pneg %p2202_p6 }
  0x19   : > { %p1673_p9 = pnand %p2218_p8, %p1671_p7 }
  0x1b   : > { %p1674_p10 = pneg %p1673_p9 }
  0x1d   : > { %p1679_p12 = pnand %p1677_p11, %p1674_p10 }
  0x1f   : > { %1682 = shalt.err (!%p1679_p12)
}
  0x20   : > { %s1683_s15 = scalar_lea.vmem %s2192_s27, 256  ;;  %p1691_p5 = scmp.lt.s32.totalorder %s2192_s27, %s2192_s27 }
  0x21   : > { %p1684_p13 = scmp.ne.s32.totalorder %s2192_s27, %s1683_s15  ;;  %p1692_p3 = scmp.lt.s32.totalorder %s1683_s15, %s1683_s15 }
  0x23   : > { %p1686_p0 = pnand %p1684_p13, %p2218_p8  ;;  %p1693_p7 = por %p1692_p3, %p1691_p5 }
  0x25   : > { %p1687_p2 = pneg %p1686_p0 }
  0x27   : > { %p1694_p9 = pnand %p1693_p7, %p1687_p2 }
  0x29   : > { %1697 = shalt.err (!%p1694_p9)
}
  0x2a   : > { %s2670_s17 = smov 128   ;;  %s2074_s18 = smov 8  }
  0x2b   : > { %1536 = dma.hbm_to_vmem [thread:$0]  (!%p2202_p6), %s2654_s0, 256, %s2192_s27, [#allocation5], %s2670_s17, %s2670_s17, %s2074_s18  }
  0x2c   : > { %s1698_s30 = scalar_lea.hbm %s2655_s1, 256 }
  0x2d   : > { %p1699_p3 = scmp.ne.s32.totalorder %s2655_s1, %s1698_s30  ;;  %p1705_p12 = scmp.lt.u32.totalorder %s1698_s30, %s2655_s1 }
  0x2f   : > { %p1701_p10 = pnand %p1699_p3, %p2218_p8 }
  0x31   : > { %p1702_p11 = pneg %p1701_p10 }
  0x33   : > { %p1707_p13 = pnand %p1705_p12, %p1702_p11 }
  0x35   : > { %1710 = shalt.err (!%p1707_p13)
}
  0x36   : > { %s1711_s27 = scalar_lea.vmem %s2206_s13, 256  ;;  %p1719_p7 = scmp.lt.s32.totalorder %s2206_s13, %s2206_s13 }
  0x37   : > { %p1712_p0 = scmp.ne.s32.totalorder %s2206_s13, %s1711_s27  ;;  %p1720_p9 = scmp.lt.s32.totalorder %s1711_s27, %s1711_s27 }
  0x39   : > { %p1714_p2 = pnand %p1712_p0, %p2218_p8  ;;  %p1721_p3 = por %p1720_p9, %p1719_p7 }
  0x3b   : > { %p1715_p5 = pneg %p1714_p2 }
  0x3d   : > { %p1722_p10 = pnand %p1721_p3, %p1715_p5 }
  0x3f   : > { %1725 = shalt.err (!%p1722_p10)
}
  0x40   : > { %1539 = dma.hbm_to_vmem [thread:$0]  (!%p2202_p6), %s2655_s1, 256, %s2206_s13, [#allocation8], %s2670_s17, %s2670_s17, %s2074_s18  }
  0x41   : > { %s1726_s20 = scalar_lea.hbm %s2658_s4, 16 }
  0x42   : > { %p1727_p11 = scmp.ne.s32.totalorder %s2658_s4, %s1726_s20  ;;  %p1733_p0 = scmp.lt.u32.totalorder %s1726_s20, %s2658_s4 }
  0x44   : > { %p1729_p12 = pnand %p1727_p11, %p2218_p8 }
  0x46   : > { %p1730_p13 = pneg %p1729_p12 }
  0x48   : > { %p1735_p2 = pnand %p1733_p0, %p1730_p13 }
  0x4a   : > { %1738 = shalt.err (!%p1735_p2)
}
  0x4b   : > { %s1739_s13 = scalar_lea.vmem %s2208_s16, 16  ;;  %s1746_s27 = scalar_lea.vmem %s2208_s16, 32 }
  0x4c   : > { %p1740_p5 = scmp.ne.s32.totalorder %s2208_s16, %s1739_s13  ;;  %p1747_p3 = scmp.lt.s32.totalorder %s2208_s16, %s2208_s16 }
  0x4d   : > { %p1748_p10 = scmp.lt.s32.totalorder %s1746_s27, %s1739_s13 }
  0x4e   : > { %p1742_p7 = pnand %p1740_p5, %p2218_p8 }
  0x4f   : > { %p1749_p11 = por %p1748_p10, %p1747_p3 }
  0x50   : > { %p1743_p9 = pneg %p1742_p7 }
  0x52   : > { %p1750_p12 = pnand %p1749_p11, %p1743_p9 }
  0x54   : > { %1753 = shalt.err (!%p1750_p12)
}
  0x55   : > { %1545 = dma.hbm_to_vmem [thread:$0]  (!%p2202_p6), %s2658_s4, 16, %s2208_s16, [#allocation12]  }
  0x56   : > { %s2075_s12 = smov [#allocation14]   ;;  %s2076_s20 = smov [#allocation10]  }
  0x57   : > { %s389_s19 = sshll.u32 %s2075_s12, 4  ;;  %s354_s21 = sshll.u32 %s2076_s20, 4  ;;  %s390_s19 = int_to_ptr.vmem [resolvable:$true] %s389_s19  ;;  %s355_s21 = int_to_ptr.vmem [resolvable:$true] %s354_s21 }
  0x58   : > { %s1754_s15 = scalar_lea.hbm %s2660_s6, 16 }
  0x59   : > { %p1755_p13 = scmp.ne.s32.totalorder %s2660_s6, %s1754_s15  ;;  %p1761_p5 = scmp.lt.u32.totalorder %s1754_s15, %s2660_s6 }
  0x5b   : > { %p1757_p0 = pnand %p1755_p13, %p2218_p8 }
  0x5d   : > { %p1758_p2 = pneg %p1757_p0 }
  0x5f   : > { %p1763_p7 = pnand %p1761_p5, %p1758_p2 }
  0x61   : > { %1766 = shalt.err (!%p1763_p7)
}
  0x62   : > { %s1767_s16 = scalar_lea.vmem %s390_s19, 16  ;;  %s1774_s11 = scalar_lea.vmem %s390_s19, 32 }
  0x63   : > { %p1768_p9 = scmp.ne.s32.totalorder %s390_s19, %s1767_s16  ;;  %p1775_p11 = scmp.lt.s32.totalorder %s390_s19, %s390_s19 }
  0x64   : > { %p1776_p12 = scmp.lt.s32.totalorder %s1774_s11, %s1767_s16 }
  0x65   : > { %p1770_p3 = pnand %p1768_p9, %p2218_p8 }
  0x66   : > { %p1777_p1 = por %p1776_p12, %p1775_p11 }
  0x67   : > { %p1771_p10 = pneg %p1770_p3 }
  0x69   : > { %p1778_p4 = pnand %p1777_p1, %p1771_p10 }
  0x6b   : > { %1781 = shalt.err (!%p1778_p4)
}
  0x6c   : > { %1551 = dma.hbm_to_vmem [thread:$0]  (!%p2202_p6), %s2660_s6, 16, %s390_s19, [#allocation15]  }
  0x6d   : > { %s1782_s30 = scalar_lea.hbm %s2657_s3, 128 }
  0x6e   : > { %p1783_p13 = scmp.ne.s32.totalorder %s2657_s3, %s1782_s30  ;;  %p1789_p4 = scmp.lt.u32.totalorder %s1782_s30, %s2657_s3 }
  0x70   : > { %p1785_p0 = pnand %p1783_p13, %p2218_p8 }
  0x72   : > { %p1786_p1 = pneg %p1785_p0 }
  0x74   : > { %p1791_p2 = pnand %p1789_p4, %p1786_p1 }
  0x76   : > { %1794 = shalt.err (!%p1791_p2)
}
  0x77   : > { %s1795_s16 = scalar_lea.vmem %s355_s21, 128  ;;  %p1803_p3 = scmp.lt.s32.totalorder %s355_s21, %s355_s21 }
  0x78   : > { %p1796_p5 = scmp.ne.s32.totalorder %s355_s21, %s1795_s16  ;;  %p1804_p10 = scmp.lt.s32.totalorder %s1795_s16, %s1795_s16 }
  0x7a   : > { %p1798_p7 = pnand %p1796_p5, %p2218_p8  ;;  %p1805_p11 = por %p1804_p10, %p1803_p3 }
  0x7c   : > { %p1799_p9 = pneg %p1798_p7 }
  0x7e   : > { %p1806_p12 = pnand %p1805_p11, %p1799_p9 }
  0x80   : > { %1809 = shalt.err (!%p1806_p12)
}
  0x81   : > { %1542 = dma.hbm_to_vmem [thread:$0]  (!%p2202_p6), %s2657_s3, 128, %s355_s21, [#allocation8]  }
  0x82   : > { %s2077_s12 = smov [#allocation13]   ;;  %s2078_s17 = smov [#allocation16]  }
  0x83   : > { %s375_s20 = sshll.u32 %s2077_s12, 4  ;;  %s400_s9 = sshll.u32 %s2078_s17, 4  ;;  %s376_s20 = int_to_ptr.vmem [resolvable:$true] %s375_s20  ;;  %s401_s9 = int_to_ptr.vmem [resolvable:$true] %s400_s9 }
  0x84   : > { %s1810_s13 = scalar_lea.hbm %s2659_s5, 1152 }
  0x85   : > { %p1811_p13 = scmp.ne.s32.totalorder %s2659_s5, %s1810_s13  ;;  %p1817_p4 = scmp.lt.u32.totalorder %s1810_s13, %s2659_s5 }
  0x87   : > { %p1813_p0 = pnand %p1811_p13, %p2218_p8 }
  0x89   : > { %p1814_p1 = pneg %p1813_p0 }
  0x8b   : > { %p1819_p2 = pnand %p1817_p4, %p1814_p1 }
  0x8d   : > { %1822 = shalt.err (!%p1819_p2)
}
  0x8e   : > { %s1823_s21 = scalar_lea.vmem %s376_s20, 1152  ;;  %p1831_p3 = scmp.lt.s32.totalorder %s376_s20, %s376_s20 }
  0x8f   : > { %p1824_p5 = scmp.ne.s32.totalorder %s376_s20, %s1823_s21  ;;  %p1832_p10 = scmp.lt.s32.totalorder %s1823_s21, %s1823_s21 }
  0x91   : > { %p1826_p7 = pnand %p1824_p5, %p2218_p8  ;;  %p1833_p11 = por %p1832_p10, %p1831_p3 }
  0x93   : > { %p1827_p9 = pneg %p1826_p7 }
  0x95   : > { %p1834_p12 = pnand %p1833_p11, %p1827_p9 }
  0x97   : > { %1837 = shalt.err (!%p1834_p12)
}
  0x98   : > { %s2680_s11 = smov 128   ;;  %s1838_s13 = scalar_lea.hbm %s2661_s7, 16 }
  0x99   : > { %1548 = dma.hbm_to_vmem [thread:$0]  (!%p2202_p6), %s2659_s5, 1152, %s376_s20, [#allocation12], %s2680_s11, %s2680_s11, %s2074_s18  }
  0x9a   : > { %p1839_p13 = scmp.ne.s32.totalorder %s2661_s7, %s1838_s13  ;;  %p1845_p4 = scmp.lt.u32.totalorder %s1838_s13, %s2661_s7 }
  0x9c   : > { %p1841_p0 = pnand %p1839_p13, %p2218_p8 }
  0x9e   : > { %p1842_p1 = pneg %p1841_p0 }
  0xa0   : > { %p1847_p2 = pnand %p1845_p4, %p1842_p1 }
  0xa2   : > { %1850 = shalt.err (!%p1847_p2)
}
  0xa3   : > { %s1851_s21 = scalar_lea.vmem %s401_s9, 16  ;;  %s1858_s20 = scalar_lea.vmem %s401_s9, 32 }
  0xa4   : > { %p1852_p5 = scmp.ne.s32.totalorder %s401_s9, %s1851_s21  ;;  %p1859_p3 = scmp.lt.s32.totalorder %s401_s9, %s401_s9 }
  0xa5   : > { %p1860_p10 = scmp.lt.s32.totalorder %s1858_s20, %s1851_s21 }
  0xa6   : > { %p1854_p7 = pnand %p1852_p5, %p2218_p8 }
  0xa7   : > { %p1861_p11 = por %p1860_p10, %p1859_p3 }
  0xa8   : > { %p1855_p9 = pneg %p1854_p7 }
  0xaa   : > { %p1862_p12 = pnand %p1861_p11, %p1855_p9 }
  0xac   : > { %1865 = shalt.err (!%p1862_p12)
}
  0xad   : > { %1554 = dma.hbm_to_vmem [thread:$0]  (!%p2202_p6), %s2661_s7, 16, %s401_s9, [#allocation15]  }
  0xae   : > { %s2079_s30 = smov [#allocation17]   ;;  %s1866_s10 = scalar_lea.hbm %s2662_s8, 16 }
  0xaf   : > { %s411_s15 = sshll.u32 %s2079_s30, 4  ;;  %p1867_p13 = scmp.ne.s32.totalorder %s2662_s8, %s1866_s10  ;;  %s412_s15 = int_to_ptr.vmem [resolvable:$true] %s411_s15 }
  0xb0   : > { %p1873_p4 = scmp.lt.u32.totalorder %s1866_s10, %s2662_s8 }
  0xb1   : > { %p1869_p0 = pnand %p1867_p13, %p2218_p8 }
  0xb3   : > { %p1870_p1 = pneg %p1869_p0 }
  0xb5   : > { %p1875_p2 = pnand %p1873_p4, %p1870_p1 }
  0xb7   : > { %1878 = shalt.err (!%p1875_p2)
}
  0xb8   : > { %s1879_s9 = scalar_lea.vmem %s412_s15, 16  ;;  %s1886_s12 = scalar_lea.vmem %s412_s15, 32 }
  0xb9   : > { %p1880_p5 = scmp.ne.s32.totalorder %s412_s15, %s1879_s9  ;;  %p1887_p3 = scmp.lt.s32.totalorder %s412_s15, %s412_s15 }
  0xba   : > { %p1888_p10 = scmp.lt.s32.totalorder %s1886_s12, %s1879_s9 }
  0xbb   : > { %p1882_p7 = pnand %p1880_p5, %p2218_p8 }
  0xbc   : > { %p1889_p11 = por %p1888_p10, %p1887_p3 }
  0xbd   : > { %p1883_p9 = pneg %p1882_p7 }
  0xbf   : > { %p1890_p12 = pnand %p1889_p11, %p1883_p9 }
  0xc1   : > { %1893 = shalt.err (!%p1890_p12)
}
  0xc2   : > { %1557 = dma.hbm_to_vmem [thread:$0]  (!%p2202_p6), %s2662_s8, 16, %s412_s15, [#allocation18]  }
  0xc3   : > { %s2386_s22 = sadd.s32 1, %s2068_s26   ;;  %s81_s14 = sadd.s32 1, %s2064_s25 }
  0xc4   : > { %s78_s13 = ssub.s32 %s2068_s26, %s2386_s22  ;;  %p88_p8 = scmp.ne.s32.totalorder %s2064_s25, %s2060_s24 }
  0xc5   : > { %p79_p13 = scmp.eq.s32.totalorder %s78_s13, 0  ;;  %p89_p0 = scmp.eq.s32.totalorder %s2068_s26, 0 }
  0xc6   : > { %p94_p1 = scmp.ne.s32.totalorder %s2060_s24, %s2056_s23  ;;  %p1570_p4 = scmp.lt.s32.totalorder %s2068_s26, 2 }
  0xc7   : > { %s2398_s27 = scalar_select %p79_p13, %s2064_s25, %s81_s14  }
  0xc8   : > { %p90_p2 = por %p89_p0, %p88_p8  ;;  %p2681_p5 = scmp.eq.s32.totalorder %s2186_s28, 0 }
  0xc9   : > { %s425_s16 = sand.u32 1, %s2068_s26   ;;  %s427_s15 = sand.u32 1, %s2064_s25  }
  0xca   : > { %p2402_p7 = por %p2681_p5, %p94_p1  ;;  %s1369_s19 = sshll.u32 %s427_s15, 4 }
  0xcb   : > { %s1411_s21 = sshll.u32 %s2068_s26, 8  ;;  %s429_s23 = scalar_lea.vmem [#allocation9], %s1369_s19 }
  0xcc   : > { %s2412_s12 = scalar_lea.hbm %s2656_s2, %s1411_s21  ;;  %s436_s17 = sshll.u32 %s429_s23, 4  ;;  %s2414_s17 = int_to_ptr.vmem [resolvable:$true] %s436_s17 }
  0xcd   : > { %p2416_p6 = pnand %p1570_p4, %p90_p2  ;;  %s2420_s26 = scalar_lea.sflag [#allocation5], %s425_s16 }
  0xce   : > { %s1894_s14 = scalar_lea.hbm %s2412_s12, 256  ;;  %s1899_s19 = scalar_lea.hbm %s2656_s2, 512 }
  0xcf   : > { %p1895_p9 = scmp.ne.s32.totalorder %s2412_s12, %s1894_s14  ;;  %p1896_p3 = pneg %p2416_p6 }
  0xd0   : > { %p1900_p12 = scmp.lt.u32.totalorder %s2412_s12, %s2656_s2  ;;  %p1901_p8 = scmp.lt.u32.totalorder %s1899_s19, %s1894_s14 }
  0xd1   : > { %p1897_p10 = pnand %p1896_p3, %p1895_p9  ;;  %p1903_p0 = scmp.lt.u32.totalorder %s1894_s14, %s2412_s12 }
  0xd2   : > { %p1902_p13 = por %p1901_p8, %p1900_p12 }
  0xd3   : > { %p1898_p11 = pneg %p1897_p10 }
  0xd4   : > { %p1904_p1 = por %p1903_p0, %p1902_p13 }
  0xd6   : > { %p1905_p4 = pnand %p1904_p1, %p1898_p11 }
  0xd8   : > { %1908 = shalt.err (!%p1905_p4)
}
  0xd9   : > { %s1909_s16 = scalar_lea.vmem %s2414_s17, 256  ;;  %s2080_s9 = smov [#allocation9]  }
  0xda   : > { %p1910_p2 = scmp.ne.s32.totalorder %s2414_s17, %s1909_s16  ;;  %s1914_s23 = sshll.u32 %s2080_s9, 4  ;;  %s1915_s23 = int_to_ptr.vmem [resolvable:$false] %s1914_s23 }
  0xdb   : > { %s1916_s13 = scalar_lea.vmem %s1915_s23, 512  ;;  %p1917_p10 = scmp.lt.s32.totalorder %s2414_s17, %s1915_s23 }
  0xdc   : > { %p1912_p5 = pnand %p1910_p2, %p1896_p3  ;;  %p1918_p12 = scmp.lt.s32.totalorder %s1916_s13, %s1909_s16 }
  0xde   : > { %p1913_p9 = pneg %p1912_p5  ;;  %p1919_p8 = por %p1918_p12, %p1917_p10 }
  0xe0   : > { %p1920_p13 = pnand %p1919_p8, %p1913_p9 }
  0xe2   : > { %1923 = shalt.err (!%p1920_p13)
}
  0xe3   : > { %1561 = dma.hbm_to_vmem [thread:$0]  (!%p2416_p6), %s2412_s12, 256, %s2414_s17, %s2420_s26, %s2680_s11, %s2680_s11, %s2074_s18  }
  0xe4   : > { %p2684_p3 = scmp.ne.s32.totalorder %s2677_s29, 0 }
  0xe5   : > { %p2685_p11 = scmp.eq.s32.totalorder (!%p2684_p3), %s2186_s28, 0 }
  0xe6   : > { %448 = sbr.rel (%p2684_p3) target bundleno = 1896 (0x768), region = 60 }
  0xed   : > { %2019 = dma.done.wait (%p2685_p11), [#allocation5], 256   ;;  %p2686_p0 = pmov %p2685_p11 }
  0xef   : > { %2021 = vsyncadd (%p2686_p0), [#allocation5], 4294967040  ;;  %p2687_p1 = pmov %p2686_p0 }
  0xf0   : > { %p2688_p4 = pmov %p2686_p0 }
  0xf1   : > { %2023 = dma.done.wait (%p2687_p1), [#allocation8], 256  }
  0xf2   : > { %2025 = vsyncadd (%p2688_p4), [#allocation8], 4294967040  ;;  %s458_s30 = sand.u32 1, %s2186_s28   ;;  %s460_s18 = sand.u32 1, %s2060_s24  }
  0xf3   : > { %s2463_s11 = sshll.u32 %s460_s18, 4  ;;  %s459_s29 = scalar_lea.sflag [#allocation5], %s458_s30 }
  0xf4   : > { %s462_s12 = scalar_lea.vmem [#allocation9], %s2463_s11 }
  0xf5   : > { %2027 = dma.done.wait (%p2402_p7), %s459_s29, 256  }
  0xf6   : > { %2029 = vsyncadd (%p2402_p7), %s459_s29, 4294967040  ;;  %p2689_p6 = pmov %p2686_p0 }
  0xf7   : > { %p2690_p2 = pmov %p2686_p0 }
  0xf8   : > { %2031 = dma.done.wait (%p2689_p6), [#allocation8], 128  }
  0xf9   : > { %2033 = vsyncadd (%p2690_p2), [#allocation8], 4294967168  ;;  %p2691_p5 = pmov %p2686_p0 }
  0xfa   : > { %p2692_p9 = pmov %p2686_p0 }
  0xfb   : > { %2035 = dma.done.wait (%p2691_p5), [#allocation12], 1168  }
  0xfc   : > { %2037 = vsyncadd (%p2692_p9), [#allocation12], 4294966128  ;;  %p2693_p10 = pmov %p2686_p0 }
  0xfd   : > { %p2694_p12 = pmov %p2686_p0 }
  0xfe   : > { %2039 = dma.done.wait (%p2693_p10), [#allocation15], 32  }
  0xff   : > { %2041 = vsyncadd (%p2694_p12), [#allocation15], 4294967264  ;;  %p2695_p7 = pmov %p2686_p0 }
 0x100   : > { %p2696_p8 = pmov %p2686_p0 }
 0x101   : > { %2043 = dma.done.wait (%p2695_p7), [#allocation18], 16  }
 0x102   : > { %2045 = vsyncadd (%p2696_p8), [#allocation18], 4294967280  ;;  %p2697_p13 = scmp.ne.s32.totalorder %s2186_s28, 0 }
 0x103   : > { %vm594_vm0 = vcmask (!%p2697_p13), 523264   ;;  %vm597_vm1 = vcmask (!%p2697_p13), 23552   ;;  %v530_v1 = vld [vmem:[#allocation10] sm:$0xff] (!%p2697_p13)  ;;  %vm544_vm2 = vcmask (!%p2697_p13), 1043456   ;;  %v2081_v3 = vmov (!%p2697_p13), 0.0   ;;  %v529_v5 = vld [vmem:[#allocation4 + $0x8] sm:$0xff] (!%p2697_p13) }
 0x104   : > { %527 = sbr.rel (%p2697_p13) target bundleno = 485 (0x1e5), region = 100  ;;  %v528_v2 = vld [vmem:[#allocation4] sm:$0xff] (!%p2697_p13)  ;;  %1433 = vmatprep.subr.bf16.mxu0 (!%p2697_p13), %v2081_v3  ;;  %595 = vst.msk [vmem:[#allocation20] sm:$0xff] (!%p2697_p13), %vm594_vm0, %v2081_v3  ;;  %596 = vst.msk [vmem:[#allocation20 + $0x8] sm:$0xff] (!%p2697_p13), %vm594_vm0, %v2081_v3  ;;  %v532_v4 = vpack.c.bf16 (!%p2697_p13), %v530_v1, %v530_v1  ;;  %vm2082_vm3 = vmmov (!%p2697_p13), 0   ;;  %vm540_vm4 = vcmask (!%p2697_p13), 64512  }
 0x105   : > { %598 = vst.msk [vmem:[#allocation22] sm:$0xff] (!%p2697_p13), %vm597_vm1, %v2081_v3  ;;  %599 = vst.msk [vmem:[#allocation22 + $0x8] sm:$0xff] (!%p2697_p13), %vm597_vm1, %v2081_v3  ;;  %1435 = vmatprep.mubr.msk.bf16.mxu0 (!%p2697_p13), %vm2082_vm3, %v2081_v3  ;;  %v531_v7 = vpack.c.bf16 (!%p2697_p13), %v529_v5, %v528_v2  ;;  %v1383_v8 = vld [vmem:[#allocation11] ss:$0 sm:$0xff] (!%p2697_p13)  ;;  %vm589_vm5 = vcmask (!%p2697_p13), 261120  }
 0x106   : > { %v546_v6 = vsel (!%p2697_p13), %vm544_vm2, %v532_v4, 0 }
 0x107   : > { %1434 = vmatpush3.bf16.msra.mxu0 (!%p2697_p13), %v546_v6 }
 0x10a   : > { %1436 = vmatmul.mubr.msk.bf16.vlgmr.msra.gmra.mrb[0].mxu0 (!%p2697_p13), %vm540_vm4, %v531_v7 }
 0x1dd   : > { %v582_v9 = vpop.f32.mrb[0].mxu0 }
 0x1de   : > { %v583_v10 = vadd.f32 %v1383_v8, %v582_v9  ;;  %v1437_v11 = vpop.f32.mrb[1].mxu0 }
 0x1df   : > { %v585_v12 = vpop.f32.mrb[2].mxu0 }
 0x1e0   : > { %590 = vst.msk [vmem:[#allocation19] sm:$0xff] %vm589_vm5, %v583_v10  ;;  %v586_v13 = vadd.f32 %v1383_v8, %v585_v12  ;;  %v1438_v14 = vpop.f32.mrb[3].mxu0 }
 0x1e2   : > { %591 = vst.msk [vmem:[#allocation19 + $0x8] sm:$0xff] %vm589_vm5, %v586_v13  ;;  %v592_v15 = vpack.c.bf16 %v586_v13, %v583_v10 }
 0x1e4   : > { %593 = vst.msk [vmem:[#allocation2] sm:$0xff] %vm589_vm5, %v592_v15 }
 0x1e5 PF: > { %v600_v16 = vld [vmem:[%s462_s12] sm:$0xff]  ;;  %v2083_v17 = vmov 1   ;;  %v2084_v18 = vmov 0   ;;  %v601_v19 = vld [vmem:[%s462_s12 + $0x8] sm:$0xff]  ;;  %v2085_v20 = vmov 0.0   ;;  %v2086_v25 = vmov 2  }
 0x1e6   : > { %1644 = vset.pattern.permute.xlu1 %v2083_v17  ;;  %1643 = vset.pattern.permute.xlu0 %v2084_v18  ;;  %v702_v22 = vld [vmem:[#allocation7] sm:$0xff]  ;;  %v703_v23 = vld [vmem:[#allocation7 + $0x8] sm:$0xff]  ;;  %v602_v26 = vlaneseq  ;;  %vm646_vm10 = vcmask 130048   ;;  %s2087_s10 = smov 64   ;;  %v826_v49 = vld [vmem:[#allocation13 + $0x18] sm:$0xff]  ;;  %vm847_vm13 = vcmask 1040384  }
 0x1e7   : > { %613 = vperm.xlu1 %1644, %v600_v16   ;;  %605 = vperm.xlu0 %1643, %v600_v16   ;;  %v1479_v24 = vpack.c.bf16 %v703_v23, %v702_v22  ;;  %v823_v45 = vld [vmem:[#allocation13] sm:$0xff]  ;;  %v824_v46 = vld [vmem:[#allocation13 + $0x8] sm:$0xff]  ;;  %v825_v47 = vld [vmem:[#allocation13 + $0x10] sm:$0xff]  ;;  %vm848_vm14 = vcmask 1041408   ;;  %v2088_v57 = vmov 65535   ;;  %vm2089_vm15 = vmmov 0  }
 0x1e8   : > { %1452 = vmatprep.subr.bf16.mxu0 %v2085_v20  ;;  %v603_v27 = vand.u32 127, %v602_v26  ;;  %v832_v48 = vpack.c.bf16 %v824_v46, %v823_v45  ;;  %v833_v50 = vpack.c.bf16 %v826_v49, %v825_v47  ;;  %v827_v51 = vld [vmem:[#allocation13 + $0x20] sm:$0xff]  ;;  %v828_v52 = vld [vmem:[#allocation13 + $0x28] sm:$0xff]  ;;  %v829_v54 = vld [vmem:[#allocation13 + $0x30] sm:$0xff]  ;;  %v849_v58 = vsel %vm847_vm13, 4294967295, %v2088_v57  ;;  %1462 = vmatprep.mubr.msk.bf16.mxu0 %vm2089_vm15, %v2085_v20  ;;  %s2090_s17 = smov 32  }
 0x1e9   : > { %v834_v53 = vpack.c.bf16 %v828_v52, %v827_v51  ;;  %v830_v55 = vld [vmem:[#allocation13 + $0x38] sm:$0xff]  ;;  %v831_v56 = vld [vmem:[#allocation13 + $0x40] sm:$0x7]  ;;  %v850_v61 = vsel %vm848_vm14, %v849_v58, 0  ;;  %s2091_s26 = smov 125   ;;  %vm816_vm0 = vcmask 261120  }
 0x1ea   : > { %1453 = vmatpush3.bf16.msra.mxu0 %v832_v48  ;;  %v835_v59 = vpack.c.bf16 %v830_v55, %v829_v54  ;;  %v836_v60 = vpack.c.bf16 %v831_v56, %v831_v56  ;;  %vm820_vm1 = vcmask 523264   ;;  %vm844_vm2 = vcmask 547840   ;;  %v2542_v17 = vld [vmem:[#allocation16] ss:$0 sm:$0xff]  ;;  %v1399_v52 = vld [vmem:[#allocation3] ss:$0 sm:$0xff] }
 0x1eb   : > { %616 = vperm.xlu1 %1644, %v601_v19   ;;  %608 = vperm.xlu0 %1643, %v601_v19   ;;  %v645_v21 = vld [vmem:[#allocation2] sm:$0xff]  ;;  %vm787_vm3 = vcmask 23552   ;;  %p1579_p3 = scmp.eq.s32.totalorder %s2186_s28, 1  ;;  %s2092_s14 = smov [#allocation19]  }
 0x1ec   : > { %1439 = vmatprep.subr.bf16.mxu1 %v645_v21  ;;  %1454 = vmatprep.subr.bf16.mxu0 %v2085_v20  ;;  %v852_v62 = vand.u32 %v850_v61, %v836_v60  ;;  %s1182_s15 = sshll.u32 %s2092_s14, 4  ;;  %s1183_s15 = int_to_ptr.vmem [resolvable:$true] %s1182_s15 }
 0x1ed   : > { %1440 = vmatpush3.bf16.msra.mxu1 %v645_v21  ;;  %s1924_s19 = scalar_lea.vmem %s1183_s15, 256  ;;  %p1931_p4 = scmp.lt.s32.totalorder %s1183_s15, %s1183_s15 }
 0x1ee   : > { %1480 = vmatprep.subr.bf16.mxu1 %v1479_v24  ;;  %1455 = vmatpush3.bf16.msra.mxu0 %v833_v50  ;;  %p1925_p11 = scmp.ne.s32.totalorder %s1183_s15, %s1924_s19  ;;  %p1932_p6 = scmp.lt.s32.totalorder %s1924_s19, %s1924_s19 }
 0x1ef   : > { %1646 = vset.pattern.permute.xlu1 %v2086_v25  ;;  %1645 = vset.pattern.permute.xlu0 %v2086_v25 }
 0x1f0   : > { %636 = vperm.xlu1 %1646, %v601_v19   ;;  %633 = vperm.xlu0 %1645, %v600_v16   ;;  %v1395_v19 = vld [vmem:[#allocation14] ss:$0 sm:$0xff]  ;;  %p1926_p0 = pnand %p1925_p11, %p1579_p3  ;;  %p1933_p2 = por %p1932_p6, %p1931_p4 }
 0x1f1   : > { %1456 = vmatprep.subr.bf16.mxu0 %v2085_v20 }
 0x1f2   : > { %1457 = vmatpush3.bf16.msra.mxu0 %v834_v53  ;;  %p1927_p1 = pneg %p1926_p0 }
 0x1f3   : > { %1458 = vmatprep.subr.bf16.mxu0 %v2085_v20 }
 0x1f4   : > { %1647 = vset.pattern.permute.xlu0 %v2084_v18  ;;  %1648 = vset.pattern.permute.xlu1 %v2084_v18  ;;  %p1934_p5 = pnand %p1933_p2, %p1927_p1 }
 0x1f6   : > { %1459 = vmatpush3.bf16.msra.mxu0 %v835_v59 }
 0x1f7   : > { %1460 = vmatprep.subr.bf16.mxu0 %v2085_v20 }
 0x1fa   : > { %1461 = vmatpush3.bf16.msra.mxu0 %v852_v62 }
 0x266   : > { %v614_v28 = vpop.permute.xlu1 %613  ;;  %v606_v29 = vpop.permute.xlu0 %605 }
 0x267   : > { %vm618_vm6 = vcmp.eq.s32.totalorder %v603_v27, %v614_v28  ;;  %vm610_vm7 = vcmp.eq.s32.totalorder %v603_v27, %v606_v29 }
 0x268   : > { %v1387_v32 = vsel %vm618_vm6, 1.0, %v2085_v20  ;;  %v2495_v33 = vsel %vm610_vm7, 1.0, %v2085_v20 }
 0x269   : > { %v630_v38 = vsub.f32 %v2495_v33, %v1387_v32 }
 0x26a   : > { %v617_v30 = vpop.permute.xlu1 %616  ;;  %v609_v31 = vpop.permute.xlu0 %608 }
 0x26b   : > { %vm619_vm8 = vcmp.eq.s32.totalorder %v603_v27, %v617_v30  ;;  %vm611_vm9 = vcmp.eq.s32.totalorder %v603_v27, %v609_v31 }
 0x26c   : > { %v1388_v34 = vsel %vm619_vm8, 1.0, %v2085_v20  ;;  %v2499_v35 = vsel %vm611_vm9, 1.0, %v2085_v20 }
 0x26d   : > { %v629_v36 = vpack.c.bf16 %v1388_v34, %v1387_v32  ;;  %v2503_v37 = vpack.c.bf16 %v2499_v35, %v2495_v33  ;;  %v631_v39 = vsub.f32 %v2499_v35, %v1388_v34 }
 0x26f   : > { %1441 = vmatprep.mubr.msk.bf16.mxu1 %vm646_vm10, %v2503_v37  ;;  %v637_v40 = vpop.permute.xlu1 %636  ;;  %v634_v41 = vpop.permute.xlu0 %633 }
 0x270   : > { %1442 = vmatmul.mubr.msk.bf16.vlgmr.msra.gmra.mrb[0].mxu1 %vm646_vm10, %v629_v36  ;;  %vm639_vm11 = vcmp.eq.s32.totalorder %v603_v27, %v637_v40  ;;  %vm638_vm12 = vcmp.eq.s32.totalorder %v603_v27, %v634_v41 }
 0x271   : > { %1449 = vmatprep.mubr.msk.f32.mxu1 %vm646_vm10, %v630_v38  ;;  %1482 = vmatpush3.bf16.msra.mxu1 %v1479_v24  ;;  %v1390_v42 = vsel %vm639_vm11, 1.0, %v2085_v20  ;;  %v1389_v43 = vsel %vm638_vm12, 1.0, %v2085_v20 }
 0x272   : > { %1466 = vmatprep.subr.bf16.mxu1 %v2085_v20  ;;  %v644_v44 = vpack.c.bf16 %v1390_v42, %v1389_v43  ;;  %v1398_v43 = vld [vmem:[#allocation17] ss:$0 sm:$0xff] }
 0x274   : > { %814 = vrot.lane.b32.xlu0 %v644_v44, %s2087_s10 }
 0x278   : > { %1450 = vmatmul.mubr.msk.f32.vlgmr.msra.gmra.mrb[4].mxu1 %vm646_vm10, %v631_v39 }
 0x279   : > { %1468 = vmatprep.mubr.msk.bf16.mxu1 %vm2089_vm15, %v2085_v20 }
 0x2e6   : > { %v815_v9 = vpop.permute.xlu0 %814 }
 0x343   : > { %v1443_v63 = vpop.f32.mrb[0].mxu1 }
 0x344   : > { %v687_v0 = vpop.f32.mrb[1].mxu1 }
 0x345   : > { %v1444_v1 = vpop.f32.mrb[2].mxu1 }
 0x346   : > { %v809_v2 = vpack.c.bf16 %v1444_v1, %v1443_v63  ;;  %v690_v3 = vpop.f32.mrb[3].mxu1 }
 0x347   : > { %v808_v4 = vpack.c.bf16 %v690_v3, %v687_v0 }
 0x348   : > { %811 = vrot.lane.b32.xlu1 %v809_v2, %s2090_s17 }
 0x34b   : > { %v2522_v5 = vpop.f32.mrb[4].mxu1 }
 0x34c   : > { %v2526_v6 = vmul.f32 %v2522_v5, %v2522_v5  ;;  %v2528_v7 = vpop.f32.mrb[5].mxu1 }
 0x34d   : > { %v2532_v8 = vmul.f32 %v2528_v7, %v2528_v7 }
 0x34e   : > { %798 = vrot.lane.b32.xlu0 %v2526_v6, %s2091_s26  ;;  %v791_v57 = vsel %vm787_vm3, %v2526_v6, 0.0 }
 0x34f   : > { %796 = vrot.lane.b32.xlu1 %v2532_v8, %s2091_s26  ;;  %v788_v58 = vsel %vm787_vm3, %v2532_v8, 0.0 }
 0x3ba   : > { %v812_v10 = vpop.permute.xlu1 %811 }
 0x3bb   : > { %v819_v11 = vsel %vm816_vm0, %v808_v4, %v812_v10 }
 0x3bc   : > { %v822_v12 = vsel %vm820_vm1, %v819_v11, %v815_v9 }
 0x3bd   : > { %1463 = vmatmul.mubr.msk.bf16.vlgmr.msra.gmra.mrb[0].mxu0 %vm844_vm2, %v822_v12 }
 0x3c0   : > { %v799_v13 = vpop.permute.xlu0 %798 }
 0x3c1   : > { %v797_v14 = vpop.permute.xlu1 %796  ;;  %v805_v15 = vsel %vm787_vm3, %v799_v13, 0.0 }
 0x3c2   : > { %806 = vadd.xlane.f32.xlu0 %v805_v15  ;;  %v802_v16 = vsel %vm787_vm3, %v797_v14, 0.0 }
 0x3c3   : > { %803 = vadd.xlane.f32.xlu1 %v802_v16 }
 0x44f   : > { %v807_v20 = vpop.xlane.xlu0 %806 }
 0x450   : > { %v804_v18 = vpop.xlane.xlu1 %803  ;;  %v921_v26 = vmul.f32 %v2542_v17, %v807_v20 }
 0x451   : > { %v920_v22 = vmul.f32 %v2542_v17, %v804_v18 }
 0x490   : > { %v888_v21 = vpop.f32.mrb[0].mxu0 }
 0x491   : > { %v889_v23 = vadd.f32 %v1395_v19, %v888_v21  ;;  %v1464_v24 = vpop.f32.mrb[1].mxu0 }
 0x492   : > { %v891_v25 = vpop.f32.mrb[2].mxu0 }
 0x493   : > { %v922_v27 = vadd.f32 %v920_v22, %v889_v23  ;;  %v892_v28 = vadd.f32 %v1395_v19, %v891_v25  ;;  %v1465_v29 = vpop.f32.mrb[3].mxu0 }
 0x495   : > { %v924_v30 = vsub.f32 0.0, %v922_v27  ;;  %v923_v31 = vadd.f32 %v921_v26, %v892_v28 }
 0x497   : > { %v926_v32 = vmul.f32 1.442695, %v924_v30  ;;  %v925_v34 = vsub.f32 0.0, %v923_v31 }
 0x499   : > { %1654 = vpow2.f32 %v926_v32  ;;  %v928_v36 = vmul.f32 1.442695, %v925_v34 }
 0x49b   : > { %1656 = vpow2.f32 %v928_v36 }
 0x4a3   : > { %v1655_v38 = vpop.eup %1654 }
 0x4a4   : > { %v930_v39 = vadd.f32 1.0, %v1655_v38 }
 0x4a5   : > { %v1657_v40 = vpop.eup %1656 }
 0x4a6   : > { %1658 = vrcp.f32 %v930_v39  ;;  %v931_v41 = vadd.f32 1.0, %v1657_v40 }
 0x4a8   : > { %1660 = vrcp.f32 %v931_v41 }
 0x4b0   : > { %v1659_v42 = vpop.eup %1658 }
 0x4b1   : > { %v936_v44 = vmul.f32 %v1659_v42, %v922_v27 }
 0x4b2   : > { %v1661_v45 = vpop.eup %1660 }
 0x4b3   : > { %v945_v46 = vmul.f32 %v1398_v43, %v936_v44  ;;  %v937_v47 = vmul.f32 %v1661_v45, %v923_v31 }
 0x4b5   : > { %v947_v48 = vsel %vm816_vm0, %v945_v46, 0.0  ;;  %v946_v49 = vmul.f32 %v1398_v43, %v937_v47  ;;  %v963_v50 = vpack.c.bf16 %v937_v47, %v936_v44 }
 0x4b6   : > { %948 = vadd.xlane.f32.xlu0 %v947_v48 }
 0x4b7   : > { %v950_v51 = vsel %vm816_vm0, %v946_v49, 0.0 }
 0x4b8   : > { %951 = vadd.xlane.f32.xlu1 %v950_v51 }
 0x543   : > { %v949_v53 = vpop.xlane.xlu0 %948 }
 0x544   : > { %v960_v54 = vadd.f32 %v1399_v52, %v949_v53 }
 0x545   : > { %v952_v55 = vpop.xlane.xlu1 %951 }
 0x546   : > { %v961_v56 = vadd.f32 %v1399_v52, %v952_v55  ;;  %1041 = vperm.xlu0 %1647, %v960_v54  }
 0x548   : > { %1046 = vperm.xlu1 %1648, %v961_v56  }
 0x565   : > { %792 = vadd.xlane.f32.xlu0 %v791_v57 }
 0x56c   : > { %789 = vadd.xlane.f32.xlu1 %v788_v58 }
 0x57d   : > { %965 = vrot.lane.b32.xlu1 %v963_v50, %s2090_s17 }
 0x592   : > { %973 = vxpose.xlu0.c.b16.start.end [1/1] (short) (narrow) %v2503_v37, 16 }
 0x5c5   : > { %v1042_v59 = vpop.permute.xlu0 %1041 }
 0x5c6   : > { %v1049_v61 = vmul.f32 %v1042_v59, %v2528_v7 }
 0x5c7   : > { %v1047_v60 = vpop.permute.xlu1 %1046 }
 0x5c8   : > { %v1050_v62 = vmul.f32 %v2522_v5, %v1047_v60 }
 0x5ca   : > { %v1649_v63 = vpack.i.bf16 %v1050_v62, %v1049_v61 }
 0x5cc   : > { %1650 = vrot.lane.b32.xlu1 %v1649_v63, %s2091_s26 }
 0x5f2   : > { %v793_v0 = vpop.xlane.xlu0 %792 }
 0x5f3   : > { %v903_v1 = vmul.f32 %v2542_v17, %v793_v0 }
 0x5f5   : > { %v905_v2 = vadd.f32 %v903_v1, %v892_v28  ;;  %1051 = vxpose.xlu1.b32.start [1/2] (short) (narrow) %v2495_v33, 16 }
 0x5f7   : > { %v907_v3 = vsub.f32 0.0, %v905_v2 }
 0x5f8   : > { %v981_v18 = vpop.trf.xlu0 }
 0x5f9   : > { %v910_v4 = vmul.f32 1.442695, %v907_v3  ;;  %v790_v6 = vpop.xlane.xlu1 %789  ;;  %1052 = vxpose.xlu1.b32.end [2/2] (short) (narrow) %v2499_v35, 16 }
 0x5fa   : > { %v902_v37 = vmul.f32 %v2542_v17, %v790_v6 }
 0x5fb   : > { %1662 = vpow2.f32 %v910_v4 }
 0x5fc   : > { %v904_v7 = vadd.f32 %v902_v37, %v889_v23 }
 0x5fd   : > { %v966_v35 = vpop.permute.xlu1 %965 }
 0x5fe   : > { %v906_v8 = vsub.f32 0.0, %v904_v7 }
 0x600   : > { %v908_v5 = vmul.f32 1.442695, %v906_v8 }
 0x602   : > { %1664 = vpow2.f32 %v908_v5 }
 0x605   : > { %v1663_v9 = vpop.eup %1662 }
 0x606   : > { %v913_v10 = vadd.f32 1.0, %v1663_v9 }
 0x608   : > { %1666 = vrcp.f32 %v913_v10 }
 0x60c   : > { %v1665_v11 = vpop.eup %1664 }
 0x60d   : > { %v912_v12 = vadd.f32 1.0, %v1665_v11 }
 0x60f   : > { %1668 = vrcp.f32 %v912_v12 }
 0x612   : > { %v1667_v13 = vpop.eup %1666 }
 0x613   : > { %v919_v14 = vmul.f32 %v1667_v13, %v905_v2 }
 0x619   : > { %v1669_v33 = vpop.eup %1668 }
 0x61a   : > { %v918_v15 = vmul.f32 %v1669_v33, %v904_v7 }
 0x61c   : > { %v962_v16 = vpack.c.bf16 %v919_v14, %v918_v15 }
 0x61e   : > { %v969_v17 = vsel %vm816_vm0, %v962_v16, %v966_v35 }
 0x61f   : > { %1467 = vmatpush3.bf16.msra.mxu1 %v969_v17 }
 0x622   : > { %1469 = vmatmul.mubr.msk.bf16.vlgmr.msra.gmra.mrb[8].mxu1 %vm646_vm10, %v981_v18 }
 0x63e   : > { %v1651_v19 = vpop.permute.xlu1 %1650 }
 0x63f   : > { %v1653_v20 = vunpack.i.h.bf16 %v1651_v19  ;;  %v1652_v21 = vunpack.i.l.bf16 %v1651_v19 }
 0x641   : > { %v1483_v22 = vpack.c.bf16 %v1653_v20, %v1652_v21 }
 0x643   : > { %1484 = vmatprep.subr.bf16.mxu1 %v1483_v22 }
 0x644   : > { %1486 = vmatpush3.bf16.msra.mxu1 %v1483_v22 }
 0x675   : > { %v1067_v23 = vpop.trf.xlu1 }
 0x676   : > { %1476 = vmatprep.mubr.msk.f32.mxu1 %vm646_vm10, %v1067_v23 }
 0x679   : > { %v1068_v24 = vpop.trf.xlu1 }
 0x67a   : > { %1477 = vmatmul.mubr.msk.f32.vlgmr.msra.gmra.mrb[6].mxu1 %vm646_vm10, %v1068_v24 }
 0x67b   : > { %1937 = shalt.err (!%p1934_p5)
}
 0x67c   : > { %s2698_s16 = sld [smem:[#allocation32_spill]] }
 0x682   : > { %s1938_s9 = scalar_lea.hbm %s2698_s16, 256 }
 0x683   : > { %p1939_p9 = scmp.ne.s32.totalorder %s2698_s16, %s1938_s9  ;;  %p1944_p7 = scmp.lt.u32.totalorder %s1938_s9, %s2698_s16 }
 0x685   : > { %p1940_p10 = pnand %p1939_p9, %p1579_p3 }
 0x687   : > { %p1941_p12 = pneg %p1940_p10 }
 0x689   : > { %p1946_p8 = pnand %p1944_p7, %p1941_p12 }
 0x68b   : > { %1949 = shalt.err (!%p1946_p8)
}
 0x68c   : > { %s2093_s11 = smov 128   ;;  %s2094_s29 = smov 8   ;;  %v971_v25 = vld [vmem:[#allocation20] sm:$0xff]  ;;  %v972_v27 = vld [vmem:[#allocation20 + $0x8] sm:$0xff] }
 0x68d   : > { %1522 = dma.vmem_to_hbm [thread:$0]  (%p1579_p3), %s1183_s15, 256, %s2698_s16, [#allocation6], %s2093_s11, %s2093_s11, %s2094_s29  }
 0x68e   : > { %s2095_s17 = smov [#allocation20]  }
 0x68f   : > { %s1195_s26 = sshll.u32 %s2095_s17, 4  ;;  %s1196_s26 = int_to_ptr.vmem [resolvable:$true] %s1195_s26 }
 0x690   : > { %s1950_s14 = scalar_lea.vmem %s1196_s26, 256  ;;  %p1957_p1 = scmp.lt.s32.totalorder %s1196_s26, %s1196_s26 }
 0x691   : > { %p1951_p13 = scmp.ne.s32.totalorder %s1196_s26, %s1950_s14  ;;  %p1958_p4 = scmp.lt.s32.totalorder %s1950_s14, %s1950_s14 }
 0x693   : > { %p1952_p11 = pnand %p1951_p13, %p1579_p3  ;;  %p1959_p6 = por %p1958_p4, %p1957_p1 }
 0x695   : > { %p1953_p0 = pneg %p1952_p11 }
 0x697   : > { %p1960_p2 = pnand %p1959_p6, %p1953_p0 }
 0x6f5   : > { %v1026_v26 = vpop.f32.mrb[8].mxu1 }
 0x6f6   : > { %v1033_v28 = vadd.f32 %v1026_v26, %v971_v25  ;;  %v1470_v29 = vpop.f32.mrb[9].mxu1 }
 0x6f7   : > { %v1029_v30 = vpop.f32.mrb[10].mxu1 }
 0x6f8   : > { %1035 = vst.msk [vmem:[#allocation20] sm:$0xff] %vm820_vm1, %v1033_v28  ;;  %v1034_v31 = vadd.f32 %v1029_v30, %v972_v27  ;;  %v1471_v32 = vpop.f32.mrb[11].mxu1 }
 0x6fa   : > { %1036 = vst.msk [vmem:[#allocation20 + $0x8] sm:$0xff] %vm820_vm1, %v1034_v31 }
 0x6fb   : > { %1963 = shalt.err (!%p1960_p2)
}
 0x6fc   : > { %s2699_s21 = sld [smem:[#allocation33_spill]] }
 0x702   : > { %s1964_s20 = scalar_lea.hbm %s2699_s21, 256 }
 0x703   : > { %p1965_p5 = scmp.ne.s32.totalorder %s2699_s21, %s1964_s20  ;;  %p1970_p12 = scmp.lt.u32.totalorder %s1964_s20, %s2699_s21 }
 0x705   : > { %p1966_p9 = pnand %p1965_p5, %p1579_p3 }
 0x707   : > { %p1967_p10 = pneg %p1966_p9 }
 0x709   : > { %p1972_p7 = pnand %p1970_p12, %p1967_p10 }
 0x70b   : > { %1975 = shalt.err (!%p1972_p7)
}
 0x70c   : > { %1524 = dma.vmem_to_hbm [thread:$0]  (%p1579_p3), %s1196_s26, 256, %s2699_s21, [#allocation21], %s2093_s11, %s2093_s11, %s2094_s29   ;;  %v1038_v34 = vld [vmem:[#allocation22 + $0x8] sm:$0xff]  ;;  %v1037_v36 = vld [vmem:[#allocation22] sm:$0xff] }
 0x70d   : > { %s2096_s10 = smov [#allocation22]  }
 0x70e   : > { %s1208_s17 = sshll.u32 %s2096_s10, 4  ;;  %s1209_s17 = int_to_ptr.vmem [resolvable:$true] %s1208_s17 }
 0x70f   : > { %s1976_s14 = scalar_lea.vmem %s1209_s17, 256  ;;  %p1983_p0 = scmp.lt.s32.totalorder %s1209_s17, %s1209_s17 }
 0x710   : > { %p1977_p8 = scmp.ne.s32.totalorder %s1209_s17, %s1976_s14  ;;  %p1984_p1 = scmp.lt.s32.totalorder %s1976_s14, %s1976_s14 }
 0x712   : > { %p1978_p13 = pnand %p1977_p8, %p1579_p3  ;;  %p1985_p4 = por %p1984_p1, %p1983_p0 }
 0x714   : > { %p1979_p11 = pneg %p1978_p13 }
 0x716   : > { %p1986_p6 = pnand %p1985_p4, %p1979_p11 }
 0x74d   : > { %v1478_v38 = vpop.f32.mrb[6].mxu1 }
 0x74e   : > { %v1173_v39 = vadd.f32 %v1478_v38, %v1038_v34  ;;  %v1163_v40 = vpop.f32.mrb[7].mxu1 }
 0x74f   : > { %v1172_v41 = vadd.f32 %v1163_v40, %v1037_v36 }
 0x750   : > { %1175 = vst.msk [vmem:[#allocation22 + $0x8] sm:$0xff] %vm787_vm3, %v1173_v39 }
 0x751   : > { %1174 = vst.msk [vmem:[#allocation22] sm:$0xff] %vm787_vm3, %v1172_v41 }
 0x752   : > { %1989 = shalt.err (!%p1986_p6)
}
 0x753   : > { %s2700_s19 = sld [smem:[#allocation34_spill]] }
 0x759   : > { %s1990_s20 = scalar_lea.hbm %s2700_s19, 256 }
 0x75a   : > { %p1991_p2 = scmp.ne.s32.totalorder %s2700_s19, %s1990_s20  ;;  %p1996_p10 = scmp.lt.u32.totalorder %s1990_s20, %s2700_s19 }
 0x75c   : > { %p1992_p5 = pnand %p1991_p2, %p1579_p3 }
 0x75e   : > { %p1993_p9 = pneg %p1992_p5 }
 0x760   : > { %p1998_p12 = pnand %p1996_p10, %p1993_p9 }
 0x762   : > { %2001 = shalt.err (!%p1998_p12)
}
 0x763   : > { %1526 = dma.vmem_to_hbm [thread:$0]  (%p1579_p3), %s1209_s17, 256, %s2700_s19, [#allocation21], %s2093_s11, %s2093_s11, %s2094_s29  }
 0x764   : > { %2047 = dma.done.wait (%p1579_p3), [#allocation6], 256  }
 0x765   : > { %2049 = vsyncadd (%p1579_p3), [#allocation6], 4294967040 }
 0x766   : > { %2051 = dma.done.wait (%p1579_p3), [#allocation21], 512  }
 0x767   : > { %2053 = vsyncadd (%p1579_p3), [#allocation21], 4294966784 }
 0x768 PF: > { %p29_p7 = scmp.ge.s32.totalorder %s2386_s22, 4   ;;  %s2701_s23 = smov %s2060_s24 }
 0x769   : > { %s2702_s24 = smov %s2064_s25  ;;  %s2703_s25 = smov %s2398_s27 }
 0x76a   : > { %s2704_s26 = smov %s2386_s22  ;;  %31 = sbr.rel (!%p29_p7) target bundleno = 12 (0xc), region = 148 }
 0x771   :  { %1232 = vsyncpa [#allocation5], 1 }
 0x772   :  { %1234 = vsyncpa [#allocation5 + $0x1], 1 }
 0x773   :  { %1235 = vsyncpa [#allocation8], 1 }
 0x774   :  { %1236 = vsyncpa [#allocation12], 1 }
 0x775   :  { %1237 = vsyncpa [#allocation15], 1 }
 0x776   :  { %1238 = vsyncpa [#allocation18], 1 }
 0x777   :  { %1239 = vsyncpa [#allocation6], 1 }
 0x778   :  { %1241 = vsyncpa [#allocation6 + $0x1], 1 }
 0x779   :  { %1242 = vsyncpa [#allocation21], 1 }

</bundles_post_ra>
